<compile_context>
chip_gen: v7x
topology: tpu7x:2x2x1
jax: 0.10.0
libtpu: 0.0.40
codegen_flags: <defaults>
</compile_context>

<pallas_src>
import functools
import math

import jax
import jax.numpy as jnp
from jax.experimental import pallas as pl
from jax.experimental.pallas import tpu as pltpu


def _layernorm(v, gamma, beta, eps=1e-5):
    mu = jnp.mean(v, axis=-1, keepdims=True)
    var = jnp.mean((v - mu) ** 2, axis=-1, keepdims=True)
    return (v - mu) * jax.lax.rsqrt(var + eps) * gamma + beta


def decoder_layer_kernel(
    x_ref,                      # (1, S, D)  f32
    n1g_ref, n1b_ref,           # (1, D)     f32
    wqkv_ref, bqkv_ref,         # (D, 3D) bf16 (q-scale folded), (1, 3D) f32
    wo_ref, bo_ref,             # (D, D) bf16, (1, D) f32
    n2g_ref, n2b_ref,           # (1, D)     f32
    w1_ref, b1_ref,             # (D, F) bf16, (1, F) f32
    w2_ref, b2_ref,             # (F, D) bf16, (1, D) f32
    o_ref,                      # (1, S, D)  f32
    *, nhead,
):
    _, S, D = x_ref.shape
    dh = D // nhead
    cdt = wqkv_ref.dtype        # MXU compute dtype (bfloat16)

    x = x_ref[0]                                     # (S, D) f32

    # Additive causal mask (0 where j <= i, -1e30 otherwise), built once per
    # grid step and shared (broadcast) across all heads.
    row = jax.lax.broadcasted_iota(jnp.int32, (S, S), 0)
    col = jax.lax.broadcasted_iota(jnp.int32, (S, S), 1)
    neg_mask = jnp.where(col <= row, 0.0, -1e30).astype(jnp.float32)

    # ---- 1) Pre-norm + causal multi-head self-attention ----
    nx = _layernorm(x, n1g_ref[0], n1b_ref[0])
    qkv = jnp.dot(nx.astype(cdt), wqkv_ref[...],
                  preferred_element_type=jnp.float32) + bqkv_ref[0]      # (S, 3D)
    qkv = qkv.astype(cdt)        # single down-cast; head-split copies move bf16

    # Q / V: head-major (H, S, dh) via lane slices (aligned when dh % 128 == 0).
    q = jnp.stack([qkv[:, h * dh:(h + 1) * dh] for h in range(nhead)], axis=0)
    v = jnp.stack([qkv[:, 2 * D + h * dh:2 * D + (h + 1) * dh]
                   for h in range(nhead)], axis=0)
    # K: one 2-D (XLU) transpose of the K slab, then sublane-aligned head
    # slices -> (H, dh, S); the score matmul below is then a standard
    # (S,dh)x(dh,S) contraction (no per-head implicit transpose).
    kT_full = qkv[:, D:2 * D].T                                          # (D, S)
    kT = jnp.stack([kT_full[h * dh:(h + 1) * dh, :] for h in range(nhead)],
                   axis=0)                                               # (H, dh, S)

    s = jnp.einsum("hqd,hdk->hqk", q, kT,
                   preferred_element_type=jnp.float32)                   # (H, S, S)
    s = s + neg_mask                                  # broadcast over heads
    s = s - jnp.max(s, axis=-1, keepdims=True)
    p = jnp.exp(s)
    p = p * pl.reciprocal(jnp.sum(p, axis=-1, keepdims=True), approx=True)

    o = jnp.einsum("hqk,hkd->hqd", p.astype(cdt), v,
                   preferred_element_type=jnp.float32)                   # (H, S, dh)
    o = o.astype(cdt)
    attn = jnp.concatenate([o[h] for h in range(nhead)], axis=-1)        # (S, D)
    attn = jnp.dot(attn, wo_ref[...],
                   preferred_element_type=jnp.float32) + bo_ref[0]

    x1 = x + attn                        # residual (dropout1 = identity, eval)

    # ---- 2) Pre-norm + feed-forward ----
    nx2 = _layernorm(x1, n2g_ref[0], n2b_ref[0])
    h1 = jnp.dot(nx2.astype(cdt), w1_ref[...],
                 preferred_element_type=jnp.float32) + b1_ref[0]
    h1 = jnp.maximum(h1, 0.0)            # ReLU (inner dropout = identity, eval)
    ff = jnp.dot(h1.astype(cdt), w2_ref[...],
                 preferred_element_type=jnp.float32) + b2_ref[0]

    o_ref[0] = x1 + ff                   # residual (dropout2 = identity, eval)


def _prepare_params(params, nhead, compute_dtype):
    """Pre-transpose weights, fold q-scale, cast matmul weights to bf16."""
    D = params["wo"].shape[0]
    dh = D // nhead
    scale = 1.0 / math.sqrt(dh)
    col_scale = jnp.concatenate(
        [jnp.full((D,), scale, jnp.float32), jnp.ones((2 * D,), jnp.float32)])

    wqkv_t = (params["wqkv"].T * col_scale[None, :]).astype(compute_dtype)  # (D, 3D)
    bqkv = params["bqkv"] * col_scale                                       # (3D,)
    wo_t = params["wo"].T.astype(compute_dtype)                             # (D, D)
    w1_t = params["w1"].T.astype(compute_dtype)                             # (D, F)
    w2_t = params["w2"].T.astype(compute_dtype)                             # (F, D)

    def r2(a):                                    # 1-D params -> (1, N) f32
        return a.reshape(1, -1).astype(jnp.float32)

    return (
        r2(params["n1g"]), r2(params["n1b"]),
        wqkv_t, r2(bqkv),
        wo_t, r2(params["bo"]),
        r2(params["n2g"]), r2(params["n2b"]),
        w1_t, r2(params["b1"]),
        w2_t, r2(params["b2"]),
    )


def decoder_layer(src_sbd, params, nhead, *, compute_dtype=jnp.bfloat16):
    """src_sbd: (Seq, Batch, D) -> (Seq, Batch, D)."""
    S, B, D = src_sbd.shape
    F = params["w1"].shape[0]

    x = jnp.transpose(src_sbd, (1, 0, 2)).astype(jnp.float32)   # (B, S, D)

    weight_args = _prepare_params(params, nhead, compute_dtype)
    args = (x,) + weight_args

    # VMEM budget: single-buffered bf16 weights + double-buffered f32 in/out
    # blocks + attention temporaries, with 2x margin; clamped to [32, 64] MiB
    # so it is valid on v5e/v6e (128 MiB physical) and v7x (64 MiB physical).
    wbytes = (3 * D * D + D * D + 2 * D * F) * 2
    abytes = 2 * 2 * S * D * 4
    tbytes = (3 * S * D + 2 * nhead * S * S + 8 * S * D + 2 * S * F) * 4
    est = wbytes + abytes + tbytes
    vmem_limit = int(min(max(2 * est, 32 << 20), 64 << 20))

    def build(single_buffer_weights):
        def wspec(a):
            nd = a.ndim
            idx = lambda b, _nd=nd: (0,) * _nd
            if single_buffer_weights:
                # Grid-invariant operands: keep a single VMEM copy.
                return pl.BlockSpec(a.shape, idx, pipeline_mode=pl.Buffered(1))
            return pl.BlockSpec(a.shape, idx)

        in_specs = [pl.BlockSpec((1, S, D), lambda b: (b, 0, 0))]
        in_specs += [wspec(a) for a in weight_args]

        return pl.pallas_call(
            functools.partial(decoder_layer_kernel, nhead=nhead),
            out_shape=jax.ShapeDtypeStruct((B, S, D), jnp.float32),
            grid=(B,),                  # >= 2 steps for B >= 2: pipelining + megacore
            in_specs=in_specs,
            out_specs=pl.BlockSpec((1, S, D), lambda b: (b, 0, 0)),
            compiler_params=pltpu.CompilerParams(
                dimension_semantics=("parallel",),
                vmem_limit_bytes=vmem_limit),
        )

    try:
        out = jax.block_until_ready(build(True)(*args))
    except Exception:
        # Fallback if this runtime rejects single-buffered (Buffered(1)) specs.
        out = build(False)(*args)

    return jnp.transpose(out, (1, 0, 2))            # back to (S, B, D)


def reference_decoder_layer(src_sbd, params, nhead):
    """Pure-JAX f32 reference mirroring the PyTorch forward (eval mode)."""
    S, B, D = src_sbd.shape
    dh = D // nhead
    x = jnp.transpose(src_sbd, (1, 0, 2))           # (B, S, D)

    nx = _layernorm(x, params["n1g"], params["n1b"])
    qkv = jnp.einsum("bsd,ed->bse", nx, params["wqkv"]) + params["bqkv"]
    q, k, v = jnp.split(qkv, 3, axis=-1)
    q = q.reshape(B, S, nhead, dh).transpose(0, 2, 1, 3) / math.sqrt(dh)
    k = k.reshape(B, S, nhead, dh).transpose(0, 2, 1, 3)
    v = v.reshape(B, S, nhead, dh).transpose(0, 2, 1, 3)
    s = jnp.einsum("bhqd,bhkd->bhqk", q, k)
    causal = jnp.tril(jnp.ones((S, S), bool))
    s = jnp.where(causal, s, -1e30)
    p = jax.nn.softmax(s, axis=-1)
    o = jnp.einsum("bhqk,bhkd->bhqd", p, v).transpose(0, 2, 1, 3).reshape(B, S, D)
    attn = jnp.einsum("bsd,ed->bse", o, params["wo"]) + params["bo"]
    x1 = x + attn

    nx2 = _layernorm(x1, params["n2g"], params["n2b"])
    h1 = jax.nn.relu(jnp.einsum("bsd,fd->bsf", nx2, params["w1"]) + params["b1"])
    ff = jnp.einsum("bsf,df->bsd", h1, params["w2"]) + params["b2"]
    out = x1 + ff
    return jnp.transpose(out, (1, 0, 2))


def init_params(key, d_model, nhead, dim_feedforward):
    ks = jax.random.split(key, 8)
    scale = 0.1
    return {
        "n1g": jnp.ones((d_model,), jnp.float32),
        "n1b": jnp.zeros((d_model,), jnp.float32),
        "wqkv": scale * jax.random.normal(ks[0], (3 * d_model, d_model), jnp.float32),
        "bqkv": scale * jax.random.normal(ks[1], (3 * d_model,), jnp.float32),
        "wo": scale * jax.random.normal(ks[2], (d_model, d_model), jnp.float32),
        "bo": scale * jax.random.normal(ks[3], (d_model,), jnp.float32),
        "n2g": jnp.ones((d_model,), jnp.float32),
        "n2b": jnp.zeros((d_model,), jnp.float32),
        "w1": scale * jax.random.normal(ks[4], (dim_feedforward, d_model), jnp.float32),
        "b1": scale * jax.random.normal(ks[5], (dim_feedforward,), jnp.float32),
        "w2": scale * jax.random.normal(ks[6], (d_model, dim_feedforward), jnp.float32),
        "b2": scale * jax.random.normal(ks[7], (d_model,), jnp.float32),
    }


if __name__ == "__main__":
    seq_len, batch, d_model, nhead, dim_feedforward = 8, 2, 32, 4, 64

    key = jax.random.PRNGKey(0)
    k_x, k_p = jax.random.split(key)
    src = jax.random.normal(k_x, (seq_len, batch, d_model), jnp.float32)
    params = init_params(k_p, d_model, nhead, dim_feedforward)

    out = decoder_layer(src, params, nhead)
    out = jax.block_until_ready(out)

    ref = reference_decoder_layer(src, params, nhead)
    assert out.shape == (seq_len, batch, d_model)
    max_err = jnp.max(jnp.abs(out - ref))
    # bf16 matmul operands with f32 accumulation -> small quantization error.
    assert jnp.allclose(out, ref, atol=2e-2, rtol=2e-2), (
        f"mismatch vs JAX reference, max abs err={max_err}")

    print("KERNEL_OK")
</pallas_src>

<mosaic_0001>
module attributes {stable_mosaic.version = 11 : i64} {
  func.func @decoder_layer_kernel(%arg0: i32, %arg1: memref<1x8x32xf32, #tpu.memory_space<vmem>>, %arg2: memref<1x32xf32, #tpu.memory_space<vmem>>, %arg3: memref<1x32xf32, #tpu.memory_space<vmem>>, %arg4: memref<32x96xbf16, #tpu.memory_space<vmem>>, %arg5: memref<1x96xf32, #tpu.memory_space<vmem>>, %arg6: memref<32x32xbf16, #tpu.memory_space<vmem>>, %arg7: memref<1x32xf32, #tpu.memory_space<vmem>>, %arg8: memref<1x32xf32, #tpu.memory_space<vmem>>, %arg9: memref<1x32xf32, #tpu.memory_space<vmem>>, %arg10: memref<32x64xbf16, #tpu.memory_space<vmem>>, %arg11: memref<1x64xf32, #tpu.memory_space<vmem>>, %arg12: memref<64x32xbf16, #tpu.memory_space<vmem>>, %arg13: memref<1x32xf32, #tpu.memory_space<vmem>>, %arg14: memref<1x8x32xf32, #tpu.memory_space<vmem>>) attributes {dimension_semantics = [#tpu.dimension_semantics<parallel>], iteration_bounds = array<i64: 2>, scalar_prefetch = 0 : i64, scratch_operands = 0 : i64, tpu.core_type = #tpu.core_type<tc>, window_params = [{transform_indices = @transform_0, window_bounds = array<i64: 1, 8, 32>}, {pipeline_mode = #tpu.pipeline_mode<synchronous>, transform_indices = @transform_1, window_bounds = array<i64: 1, 32>}, {pipeline_mode = #tpu.pipeline_mode<synchronous>, transform_indices = @transform_2, window_bounds = array<i64: 1, 32>}, {pipeline_mode = #tpu.pipeline_mode<synchronous>, transform_indices = @transform_3, window_bounds = array<i64: 32, 96>}, {pipeline_mode = #tpu.pipeline_mode<synchronous>, transform_indices = @transform_4, window_bounds = array<i64: 1, 96>}, {pipeline_mode = #tpu.pipeline_mode<synchronous>, transform_indices = @transform_5, window_bounds = array<i64: 32, 32>}, {pipeline_mode = #tpu.pipeline_mode<synchronous>, transform_indices = @transform_6, window_bounds = array<i64: 1, 32>}, {pipeline_mode = #tpu.pipeline_mode<synchronous>, transform_indices = @transform_7, window_bounds = array<i64: 1, 32>}, {pipeline_mode = #tpu.pipeline_mode<synchronous>, transform_indices = @transform_8, window_bounds = array<i64: 1, 32>}, {pipeline_mode = #tpu.pipeline_mode<synchronous>, transform_indices = @transform_9, window_bounds = array<i64: 32, 64>}, {pipeline_mode = #tpu.pipeline_mode<synchronous>, transform_indices = @transform_10, window_bounds = array<i64: 1, 64>}, {pipeline_mode = #tpu.pipeline_mode<synchronous>, transform_indices = @transform_11, window_bounds = array<i64: 64, 32>}, {pipeline_mode = #tpu.pipeline_mode<synchronous>, transform_indices = @transform_12, window_bounds = array<i64: 1, 32>}, {transform_indices = @transform_13, window_bounds = array<i64: 1, 8, 32>}]} {
    %c0 = arith.constant 0 : index
    %c0_0 = arith.constant 0 : index
    %c0_1 = arith.constant 0 : index
    %0 = vector.load %arg1[%c0, %c0_0, %c0_1] : memref<1x8x32xf32, #tpu.memory_space<vmem>>, vector<1x8x32xf32>
    %1 = vector.shape_cast %0 : vector<1x8x32xf32> to vector<8x32xf32>
    %2 = tpu.iota {dimensions = array<i32: 0>} : vector<8x8xi32>
    %3 = tpu.iota {dimensions = array<i32: 1>} : vector<8x8xi32>
    %4 = arith.cmpi sle, %3, %2 : vector<8x8xi32>
    %cst = arith.constant 0.000000e+00 : f32
    %cst_2 = arith.constant -1.000000e+30 : f32
    %5 = vector.broadcast %cst : f32 to vector<8x8xf32>
    %6 = vector.broadcast %cst_2 : f32 to vector<8x8xf32>
    %7 = arith.select %4, %5, %6 : vector<8x8xi1>, vector<8x8xf32>
    %c0_3 = arith.constant 0 : index
    %c0_4 = arith.constant 0 : index
    %8 = vector.load %arg2[%c0_3, %c0_4] : memref<1x32xf32, #tpu.memory_space<vmem>>, vector<1x32xf32>
    %9 = vector.shape_cast %8 : vector<1x32xf32> to vector<32xf32>
    %c0_5 = arith.constant 0 : index
    %c0_6 = arith.constant 0 : index
    %10 = vector.load %arg3[%c0_5, %c0_6] : memref<1x32xf32, #tpu.memory_space<vmem>>, vector<1x32xf32>
    %11 = vector.shape_cast %10 : vector<1x32xf32> to vector<32xf32>
    %cst_7 = arith.constant dense<0.000000e+00> : vector<8xf32>
    %12 = vector.multi_reduction <add>, %1, %cst_7 [1] : vector<8x32xf32> to vector<8xf32>
    %13 = vector.shape_cast %12 : vector<8xf32> to vector<8x1xf32>
    %cst_8 = arith.constant 3.200000e+01 : f32
    %14 = vector.broadcast %cst_8 : f32 to vector<8x1xf32>
    %15 = arith.divf %13, %14 : vector<8x1xf32>
    %16 = vector.broadcast %15 : vector<8x1xf32> to vector<8x32xf32>
    %17 = arith.subf %1, %16 : vector<8x32xf32>
    %18 = arith.mulf %17, %17 : vector<8x32xf32>
    %cst_9 = arith.constant dense<0.000000e+00> : vector<8xf32>
    %19 = vector.multi_reduction <add>, %18, %cst_9 [1] : vector<8x32xf32> to vector<8xf32>
    %20 = vector.shape_cast %19 : vector<8xf32> to vector<8x1xf32>
    %cst_10 = arith.constant 3.200000e+01 : f32
    %21 = vector.broadcast %cst_10 : f32 to vector<8x1xf32>
    %22 = arith.divf %20, %21 : vector<8x1xf32>
    %23 = vector.broadcast %15 : vector<8x1xf32> to vector<8x32xf32>
    %24 = arith.subf %1, %23 : vector<8x32xf32>
    %cst_11 = arith.constant 9.99999974E-6 : f32
    %25 = vector.broadcast %cst_11 : f32 to vector<8x1xf32>
    %26 = arith.addf %22, %25 : vector<8x1xf32>
    %27 = math.rsqrt %26 : vector<8x1xf32>
    %28 = vector.broadcast %27 : vector<8x1xf32> to vector<8x32xf32>
    %29 = arith.mulf %24, %28 : vector<8x32xf32>
    %30 = vector.shape_cast %9 : vector<32xf32> to vector<1x32xf32>
    %31 = vector.broadcast %30 : vector<1x32xf32> to vector<8x32xf32>
    %32 = arith.mulf %29, %31 : vector<8x32xf32>
    %33 = vector.shape_cast %11 : vector<32xf32> to vector<1x32xf32>
    %34 = vector.broadcast %33 : vector<1x32xf32> to vector<8x32xf32>
    %35 = arith.addf %32, %34 : vector<8x32xf32>
    %36 = arith.truncf %35 : vector<8x32xf32> to vector<8x32xbf16>
    %c0_12 = arith.constant 0 : index
    %c0_13 = arith.constant 0 : index
    %37 = vector.load %arg4[%c0_12, %c0_13] : memref<32x96xbf16, #tpu.memory_space<vmem>>, vector<32x96xbf16>
    %cst_14 = arith.constant dense<0.000000e+00> : vector<8x96xf32>
    %38 = tpu.matmul %36, %37, %cst_14 {dimension_numbers = #tpu.dot_dimension_numbers<[1], [0], [0], [1], [0, 0, 1, 1], [], []>} : vector<8x32xbf16>, vector<32x96xbf16>, vector<8x96xf32> -> vector<8x96xf32>
    %c0_15 = arith.constant 0 : index
    %c0_16 = arith.constant 0 : index
    %39 = vector.load %arg5[%c0_15, %c0_16] : memref<1x96xf32, #tpu.memory_space<vmem>>, vector<1x96xf32>
    %40 = vector.shape_cast %39 : vector<1x96xf32> to vector<96xf32>
    %41 = vector.shape_cast %40 : vector<96xf32> to vector<1x96xf32>
    %42 = vector.broadcast %41 : vector<1x96xf32> to vector<8x96xf32>
    %43 = arith.addf %38, %42 : vector<8x96xf32>
    %44 = arith.truncf %43 : vector<8x96xf32> to vector<8x96xbf16>
    %45 = vector.extract_strided_slice %44 {offsets = [0, 0], sizes = [8, 8], strides = [1, 1]} : vector<8x96xbf16> to vector<8x8xbf16>
    %46 = vector.extract_strided_slice %44 {offsets = [0, 8], sizes = [8, 8], strides = [1, 1]} : vector<8x96xbf16> to vector<8x8xbf16>
    %47 = vector.extract_strided_slice %44 {offsets = [0, 16], sizes = [8, 8], strides = [1, 1]} : vector<8x96xbf16> to vector<8x8xbf16>
    %48 = vector.extract_strided_slice %44 {offsets = [0, 24], sizes = [8, 8], strides = [1, 1]} : vector<8x96xbf16> to vector<8x8xbf16>
    %49 = vector.shape_cast %45 : vector<8x8xbf16> to vector<1x8x8xbf16>
    %50 = vector.shape_cast %46 : vector<8x8xbf16> to vector<1x8x8xbf16>
    %51 = vector.shape_cast %47 : vector<8x8xbf16> to vector<1x8x8xbf16>
    %52 = vector.shape_cast %48 : vector<8x8xbf16> to vector<1x8x8xbf16>
    %53 = tpu.concatenate %49, %50, %51, %52 in 0 : vector<1x8x8xbf16>, vector<1x8x8xbf16>, vector<1x8x8xbf16>, vector<1x8x8xbf16> -> vector<4x8x8xbf16>
    %54 = vector.extract_strided_slice %44 {offsets = [0, 64], sizes = [8, 8], strides = [1, 1]} : vector<8x96xbf16> to vector<8x8xbf16>
    %55 = vector.extract_strided_slice %44 {offsets = [0, 72], sizes = [8, 8], strides = [1, 1]} : vector<8x96xbf16> to vector<8x8xbf16>
    %56 = vector.extract_strided_slice %44 {offsets = [0, 80], sizes = [8, 8], strides = [1, 1]} : vector<8x96xbf16> to vector<8x8xbf16>
    %57 = vector.extract_strided_slice %44 {offsets = [0, 88], sizes = [8, 8], strides = [1, 1]} : vector<8x96xbf16> to vector<8x8xbf16>
    %58 = vector.shape_cast %54 : vector<8x8xbf16> to vector<1x8x8xbf16>
    %59 = vector.shape_cast %55 : vector<8x8xbf16> to vector<1x8x8xbf16>
    %60 = vector.shape_cast %56 : vector<8x8xbf16> to vector<1x8x8xbf16>
    %61 = vector.shape_cast %57 : vector<8x8xbf16> to vector<1x8x8xbf16>
    %62 = tpu.concatenate %58, %59, %60, %61 in 0 : vector<1x8x8xbf16>, vector<1x8x8xbf16>, vector<1x8x8xbf16>, vector<1x8x8xbf16> -> vector<4x8x8xbf16>
    %63 = vector.extract_strided_slice %44 {offsets = [0, 32], sizes = [8, 32], strides = [1, 1]} : vector<8x96xbf16> to vector<8x32xbf16>
    %64 = tpu.transpose %63, [1, 0] : vector<8x32xbf16> -> vector<32x8xbf16>
    %65 = vector.extract_strided_slice %64 {offsets = [0, 0], sizes = [8, 8], strides = [1, 1]} : vector<32x8xbf16> to vector<8x8xbf16>
    %66 = vector.extract_strided_slice %64 {offsets = [8, 0], sizes = [8, 8], strides = [1, 1]} : vector<32x8xbf16> to vector<8x8xbf16>
    %67 = vector.extract_strided_slice %64 {offsets = [16, 0], sizes = [8, 8], strides = [1, 1]} : vector<32x8xbf16> to vector<8x8xbf16>
    %68 = vector.extract_strided_slice %64 {offsets = [24, 0], sizes = [8, 8], strides = [1, 1]} : vector<32x8xbf16> to vector<8x8xbf16>
    %69 = vector.shape_cast %65 : vector<8x8xbf16> to vector<1x8x8xbf16>
    %70 = vector.shape_cast %66 : vector<8x8xbf16> to vector<1x8x8xbf16>
    %71 = vector.shape_cast %67 : vector<8x8xbf16> to vector<1x8x8xbf16>
    %72 = vector.shape_cast %68 : vector<8x8xbf16> to vector<1x8x8xbf16>
    %73 = tpu.concatenate %69, %70, %71, %72 in 0 : vector<1x8x8xbf16>, vector<1x8x8xbf16>, vector<1x8x8xbf16>, vector<1x8x8xbf16> -> vector<4x8x8xbf16>
    "tpu.trace_start"() <{level = 10 : i32, message = "hqd,hdk->hqk"}> : () -> ()
    %cst_17 = arith.constant dense<0.000000e+00> : vector<4x8x8xf32>
    %74 = tpu.matmul %53, %73, %cst_17 {dimension_numbers = #tpu.dot_dimension_numbers<[2], [1], [1], [2], [0, 0, 0, 1, 1, 2], [0], [0]>} : vector<4x8x8xbf16>, vector<4x8x8xbf16>, vector<4x8x8xf32> -> vector<4x8x8xf32>
    "tpu.trace_stop"() : () -> ()
    %75 = vector.shape_cast %7 : vector<8x8xf32> to vector<1x8x8xf32>
    %76 = vector.broadcast %75 : vector<1x8x8xf32> to vector<4x8x8xf32>
    %77 = arith.addf %74, %76 : vector<4x8x8xf32>
    %cst_18 = arith.constant dense<0xFF800000> : vector<4x8xf32>
    %78 = vector.multi_reduction <maximumf>, %77, %cst_18 [2] : vector<4x8x8xf32> to vector<4x8xf32>
    %79 = vector.shape_cast %78 : vector<4x8xf32> to vector<4x8x1xf32>
    %80 = vector.broadcast %79 : vector<4x8x1xf32> to vector<4x8x8xf32>
    %81 = arith.subf %77, %80 : vector<4x8x8xf32>
    %82 = math.exp %81 : vector<4x8x8xf32>
    %cst_19 = arith.constant dense<0.000000e+00> : vector<4x8xf32>
    %83 = vector.multi_reduction <add>, %82, %cst_19 [2] : vector<4x8x8xf32> to vector<4x8xf32>
    %84 = vector.shape_cast %83 : vector<4x8xf32> to vector<4x8x1xf32>
    %85 = tpu.reciprocal %84 {approx = true} : vector<4x8x1xf32> -> vector<4x8x1xf32>
    %86 = vector.broadcast %85 : vector<4x8x1xf32> to vector<4x8x8xf32>
    %87 = arith.mulf %82, %86 : vector<4x8x8xf32>
    %88 = arith.truncf %87 : vector<4x8x8xf32> to vector<4x8x8xbf16>
    "tpu.trace_start"() <{level = 10 : i32, message = "hqk,hkd->hqd"}> : () -> ()
    %cst_20 = arith.constant dense<0.000000e+00> : vector<4x8x8xf32>
    %89 = tpu.matmul %88, %62, %cst_20 {dimension_numbers = #tpu.dot_dimension_numbers<[2], [1], [1], [2], [0, 0, 0, 1, 1, 2], [0], [0]>} : vector<4x8x8xbf16>, vector<4x8x8xbf16>, vector<4x8x8xf32> -> vector<4x8x8xf32>
    "tpu.trace_stop"() : () -> ()
    %90 = arith.truncf %89 : vector<4x8x8xf32> to vector<4x8x8xbf16>
    %91 = vector.extract_strided_slice %90 {offsets = [0, 0, 0], sizes = [1, 8, 8], strides = [1, 1, 1]} : vector<4x8x8xbf16> to vector<1x8x8xbf16>
    %92 = vector.shape_cast %91 : vector<1x8x8xbf16> to vector<8x8xbf16>
    %93 = vector.extract_strided_slice %90 {offsets = [1, 0, 0], sizes = [1, 8, 8], strides = [1, 1, 1]} : vector<4x8x8xbf16> to vector<1x8x8xbf16>
    %94 = vector.shape_cast %93 : vector<1x8x8xbf16> to vector<8x8xbf16>
    %95 = vector.extract_strided_slice %90 {offsets = [2, 0, 0], sizes = [1, 8, 8], strides = [1, 1, 1]} : vector<4x8x8xbf16> to vector<1x8x8xbf16>
    %96 = vector.shape_cast %95 : vector<1x8x8xbf16> to vector<8x8xbf16>
    %97 = vector.extract_strided_slice %90 {offsets = [3, 0, 0], sizes = [1, 8, 8], strides = [1, 1, 1]} : vector<4x8x8xbf16> to vector<1x8x8xbf16>
    %98 = vector.shape_cast %97 : vector<1x8x8xbf16> to vector<8x8xbf16>
    %99 = tpu.concatenate %92, %94, %96, %98 in 1 : vector<8x8xbf16>, vector<8x8xbf16>, vector<8x8xbf16>, vector<8x8xbf16> -> vector<8x32xbf16>
    %c0_21 = arith.constant 0 : index
    %c0_22 = arith.constant 0 : index
    %100 = vector.load %arg6[%c0_21, %c0_22] : memref<32x32xbf16, #tpu.memory_space<vmem>>, vector<32x32xbf16>
    %cst_23 = arith.constant dense<0.000000e+00> : vector<8x32xf32>
    %101 = tpu.matmul %99, %100, %cst_23 {dimension_numbers = #tpu.dot_dimension_numbers<[1], [0], [0], [1], [0, 0, 1, 1], [], []>} : vector<8x32xbf16>, vector<32x32xbf16>, vector<8x32xf32> -> vector<8x32xf32>
    %c0_24 = arith.constant 0 : index
    %c0_25 = arith.constant 0 : index
    %102 = vector.load %arg7[%c0_24, %c0_25] : memref<1x32xf32, #tpu.memory_space<vmem>>, vector<1x32xf32>
    %103 = vector.shape_cast %102 : vector<1x32xf32> to vector<32xf32>
    %104 = vector.shape_cast %103 : vector<32xf32> to vector<1x32xf32>
    %105 = vector.broadcast %104 : vector<1x32xf32> to vector<8x32xf32>
    %106 = arith.addf %101, %105 : vector<8x32xf32>
    %107 = arith.addf %1, %106 : vector<8x32xf32>
    %c0_26 = arith.constant 0 : index
    %c0_27 = arith.constant 0 : index
    %108 = vector.load %arg8[%c0_26, %c0_27] : memref<1x32xf32, #tpu.memory_space<vmem>>, vector<1x32xf32>
    %109 = vector.shape_cast %108 : vector<1x32xf32> to vector<32xf32>
    %c0_28 = arith.constant 0 : index
    %c0_29 = arith.constant 0 : index
    %110 = vector.load %arg9[%c0_28, %c0_29] : memref<1x32xf32, #tpu.memory_space<vmem>>, vector<1x32xf32>
    %111 = vector.shape_cast %110 : vector<1x32xf32> to vector<32xf32>
    %cst_30 = arith.constant dense<0.000000e+00> : vector<8xf32>
    %112 = vector.multi_reduction <add>, %107, %cst_30 [1] : vector<8x32xf32> to vector<8xf32>
    %113 = vector.shape_cast %112 : vector<8xf32> to vector<8x1xf32>
    %cst_31 = arith.constant 3.200000e+01 : f32
    %114 = vector.broadcast %cst_31 : f32 to vector<8x1xf32>
    %115 = arith.divf %113, %114 : vector<8x1xf32>
    %116 = vector.broadcast %115 : vector<8x1xf32> to vector<8x32xf32>
    %117 = arith.subf %107, %116 : vector<8x32xf32>
    %118 = arith.mulf %117, %117 : vector<8x32xf32>
    %cst_32 = arith.constant dense<0.000000e+00> : vector<8xf32>
    %119 = vector.multi_reduction <add>, %118, %cst_32 [1] : vector<8x32xf32> to vector<8xf32>
    %120 = vector.shape_cast %119 : vector<8xf32> to vector<8x1xf32>
    %cst_33 = arith.constant 3.200000e+01 : f32
    %121 = vector.broadcast %cst_33 : f32 to vector<8x1xf32>
    %122 = arith.divf %120, %121 : vector<8x1xf32>
    %123 = vector.broadcast %115 : vector<8x1xf32> to vector<8x32xf32>
    %124 = arith.subf %107, %123 : vector<8x32xf32>
    %cst_34 = arith.constant 9.99999974E-6 : f32
    %125 = vector.broadcast %cst_34 : f32 to vector<8x1xf32>
    %126 = arith.addf %122, %125 : vector<8x1xf32>
    %127 = math.rsqrt %126 : vector<8x1xf32>
    %128 = vector.broadcast %127 : vector<8x1xf32> to vector<8x32xf32>
    %129 = arith.mulf %124, %128 : vector<8x32xf32>
    %130 = vector.shape_cast %109 : vector<32xf32> to vector<1x32xf32>
    %131 = vector.broadcast %130 : vector<1x32xf32> to vector<8x32xf32>
    %132 = arith.mulf %129, %131 : vector<8x32xf32>
    %133 = vector.shape_cast %111 : vector<32xf32> to vector<1x32xf32>
    %134 = vector.broadcast %133 : vector<1x32xf32> to vector<8x32xf32>
    %135 = arith.addf %132, %134 : vector<8x32xf32>
    %136 = arith.truncf %135 : vector<8x32xf32> to vector<8x32xbf16>
    %c0_35 = arith.constant 0 : index
    %c0_36 = arith.constant 0 : index
    %137 = vector.load %arg10[%c0_35, %c0_36] : memref<32x64xbf16, #tpu.memory_space<vmem>>, vector<32x64xbf16>
    %cst_37 = arith.constant dense<0.000000e+00> : vector<8x64xf32>
    %138 = tpu.matmul %136, %137, %cst_37 {dimension_numbers = #tpu.dot_dimension_numbers<[1], [0], [0], [1], [0, 0, 1, 1], [], []>} : vector<8x32xbf16>, vector<32x64xbf16>, vector<8x64xf32> -> vector<8x64xf32>
    %c0_38 = arith.constant 0 : index
    %c0_39 = arith.constant 0 : index
    %139 = vector.load %arg11[%c0_38, %c0_39] : memref<1x64xf32, #tpu.memory_space<vmem>>, vector<1x64xf32>
    %140 = vector.shape_cast %139 : vector<1x64xf32> to vector<64xf32>
    %141 = vector.shape_cast %140 : vector<64xf32> to vector<1x64xf32>
    %142 = vector.broadcast %141 : vector<1x64xf32> to vector<8x64xf32>
    %143 = arith.addf %138, %142 : vector<8x64xf32>
    %cst_40 = arith.constant 0.000000e+00 : f32
    %144 = vector.broadcast %cst_40 : f32 to vector<8x64xf32>
    %145 = arith.maximumf %143, %144 : vector<8x64xf32>
    %146 = arith.truncf %145 : vector<8x64xf32> to vector<8x64xbf16>
    %c0_41 = arith.constant 0 : index
    %c0_42 = arith.constant 0 : index
    %147 = vector.load %arg12[%c0_41, %c0_42] : memref<64x32xbf16, #tpu.memory_space<vmem>>, vector<64x32xbf16>
    %cst_43 = arith.constant dense<0.000000e+00> : vector<8x32xf32>
    %148 = tpu.matmul %146, %147, %cst_43 {dimension_numbers = #tpu.dot_dimension_numbers<[1], [0], [0], [1], [0, 0, 1, 1], [], []>} : vector<8x64xbf16>, vector<64x32xbf16>, vector<8x32xf32> -> vector<8x32xf32>
    %c0_44 = arith.constant 0 : index
    %c0_45 = arith.constant 0 : index
    %149 = vector.load %arg13[%c0_44, %c0_45] : memref<1x32xf32, #tpu.memory_space<vmem>>, vector<1x32xf32>
    %150 = vector.shape_cast %149 : vector<1x32xf32> to vector<32xf32>
    %151 = vector.shape_cast %150 : vector<32xf32> to vector<1x32xf32>
    %152 = vector.broadcast %151 : vector<1x32xf32> to vector<8x32xf32>
    %153 = arith.addf %148, %152 : vector<8x32xf32>
    %154 = arith.addf %107, %153 : vector<8x32xf32>
    %c0_46 = arith.constant 0 : index
    %c0_47 = arith.constant 0 : index
    %c0_48 = arith.constant 0 : index
    %155 = vector.load %arg14[%c0_46, %c0_47, %c0_48] : memref<1x8x32xf32, #tpu.memory_space<vmem>>, vector<1x8x32xf32>
    %156 = vector.shape_cast %155 : vector<1x8x32xf32> to vector<8x32xf32>
    %157 = vector.shape_cast %154 : vector<8x32xf32> to vector<1x8x32xf32>
    tpu.vector_store %arg14[%c0_46, %c0_47, %c0_48], %157 {strides = array<i32>} : memref<1x8x32xf32, #tpu.memory_space<vmem>>, vector<1x8x32xf32>,
    return
  }
  func.func @transform_0(%arg0: i32) -> (i32, i32, i32) {
    %c0_i32 = arith.constant 0 : i32
    %c0_i32_0 = arith.constant 0 : i32
    %c0_i32_1 = arith.constant 0 : i32
    return %arg0, %c0_i32, %c0_i32_0 : i32, i32, i32
  }
  func.func @transform_1(%arg0: i32) -> (i32, i32) {
    %c0_i32 = arith.constant 0 : i32
    %c0_i32_0 = arith.constant 0 : i32
    %c0_i32_1 = arith.constant 0 : i32
    return %c0_i32, %c0_i32_0 : i32, i32
  }
  func.func @transform_2(%arg0: i32) -> (i32, i32) {
    %c0_i32 = arith.constant 0 : i32
    %c0_i32_0 = arith.constant 0 : i32
    %c0_i32_1 = arith.constant 0 : i32
    return %c0_i32, %c0_i32_0 : i32, i32
  }
  func.func @transform_3(%arg0: i32) -> (i32, i32) {
    %c0_i32 = arith.constant 0 : i32
    %c0_i32_0 = arith.constant 0 : i32
    %c0_i32_1 = arith.constant 0 : i32
    return %c0_i32, %c0_i32_0 : i32, i32
  }
  func.func @transform_4(%arg0: i32) -> (i32, i32) {
    %c0_i32 = arith.constant 0 : i32
    %c0_i32_0 = arith.constant 0 : i32
    %c0_i32_1 = arith.constant 0 : i32
    return %c0_i32, %c0_i32_0 : i32, i32
  }
  func.func @transform_5(%arg0: i32) -> (i32, i32) {
    %c0_i32 = arith.constant 0 : i32
    %c0_i32_0 = arith.constant 0 : i32
    %c0_i32_1 = arith.constant 0 : i32
    return %c0_i32, %c0_i32_0 : i32, i32
  }
  func.func @transform_6(%arg0: i32) -> (i32, i32) {
    %c0_i32 = arith.constant 0 : i32
    %c0_i32_0 = arith.constant 0 : i32
    %c0_i32_1 = arith.constant 0 : i32
    return %c0_i32, %c0_i32_0 : i32, i32
  }
  func.func @transform_7(%arg0: i32) -> (i32, i32) {
    %c0_i32 = arith.constant 0 : i32
    %c0_i32_0 = arith.constant 0 : i32
    %c0_i32_1 = arith.constant 0 : i32
    return %c0_i32, %c0_i32_0 : i32, i32
  }
  func.func @transform_8(%arg0: i32) -> (i32, i32) {
    %c0_i32 = arith.constant 0 : i32
    %c0_i32_0 = arith.constant 0 : i32
    %c0_i32_1 = arith.constant 0 : i32
    return %c0_i32, %c0_i32_0 : i32, i32
  }
  func.func @transform_9(%arg0: i32) -> (i32, i32) {
    %c0_i32 = arith.constant 0 : i32
    %c0_i32_0 = arith.constant 0 : i32
    %c0_i32_1 = arith.constant 0 : i32
    return %c0_i32, %c0_i32_0 : i32, i32
  }
  func.func @transform_10(%arg0: i32) -> (i32, i32) {
    %c0_i32 = arith.constant 0 : i32
    %c0_i32_0 = arith.constant 0 : i32
    %c0_i32_1 = arith.constant 0 : i32
    return %c0_i32, %c0_i32_0 : i32, i32
  }
  func.func @transform_11(%arg0: i32) -> (i32, i32) {
    %c0_i32 = arith.constant 0 : i32
    %c0_i32_0 = arith.constant 0 : i32
    %c0_i32_1 = arith.constant 0 : i32
    return %c0_i32, %c0_i32_0 : i32, i32
  }
  func.func @transform_12(%arg0: i32) -> (i32, i32) {
    %c0_i32 = arith.constant 0 : i32
    %c0_i32_0 = arith.constant 0 : i32
    %c0_i32_1 = arith.constant 0 : i32
    return %c0_i32, %c0_i32_0 : i32, i32
  }
  func.func @transform_13(%arg0: i32) -> (i32, i32, i32) {
    %c0_i32 = arith.constant 0 : i32
    %c0_i32_0 = arith.constant 0 : i32
    %c0_i32_1 = arith.constant 0 : i32
    return %arg0, %c0_i32, %c0_i32_0 : i32, i32, i32
  }
}

module attributes {stable_mosaic.version = 11 : i64} {
  func.func @decoder_layer_kernel(%arg0: i32, %arg1: memref<1x8x32xf32, #tpu.memory_space<vmem>>, %arg2: memref<1x32xf32, #tpu.memory_space<vmem>>, %arg3: memref<1x32xf32, #tpu.memory_space<vmem>>, %arg4: memref<32x96xbf16, #tpu.memory_space<vmem>>, %arg5: memref<1x96xf32, #tpu.memory_space<vmem>>, %arg6: memref<32x32xbf16, #tpu.memory_space<vmem>>, %arg7: memref<1x32xf32, #tpu.memory_space<vmem>>, %arg8: memref<1x32xf32, #tpu.memory_space<vmem>>, %arg9: memref<1x32xf32, #tpu.memory_space<vmem>>, %arg10: memref<32x64xbf16, #tpu.memory_space<vmem>>, %arg11: memref<1x64xf32, #tpu.memory_space<vmem>>, %arg12: memref<64x32xbf16, #tpu.memory_space<vmem>>, %arg13: memref<1x32xf32, #tpu.memory_space<vmem>>, %arg14: memref<1x8x32xf32, #tpu.memory_space<vmem>>) attributes {dimension_semantics = [#tpu.dimension_semantics<parallel>], iteration_bounds = array<i64: 2>, scalar_prefetch = 0 : i64, scratch_operands = 0 : i64, tpu.core_type = #tpu.core_type<tc>, window_params = [{transform_indices = @transform_0, window_bounds = array<i64: 1, 8, 32>}, {pipeline_mode = #tpu.pipeline_mode<synchronous>, transform_indices = @transform_1, window_bounds = array<i64: 1, 32>}, {pipeline_mode = #tpu.pipeline_mode<synchronous>, transform_indices = @transform_2, window_bounds = array<i64: 1, 32>}, {pipeline_mode = #tpu.pipeline_mode<synchronous>, transform_indices = @transform_3, window_bounds = array<i64: 32, 96>}, {pipeline_mode = #tpu.pipeline_mode<synchronous>, transform_indices = @transform_4, window_bounds = array<i64: 1, 96>}, {pipeline_mode = #tpu.pipeline_mode<synchronous>, transform_indices = @transform_5, window_bounds = array<i64: 32, 32>}, {pipeline_mode = #tpu.pipeline_mode<synchronous>, transform_indices = @transform_6, window_bounds = array<i64: 1, 32>}, {pipeline_mode = #tpu.pipeline_mode<synchronous>, transform_indices = @transform_7, window_bounds = array<i64: 1, 32>}, {pipeline_mode = #tpu.pipeline_mode<synchronous>, transform_indices = @transform_8, window_bounds = array<i64: 1, 32>}, {pipeline_mode = #tpu.pipeline_mode<synchronous>, transform_indices = @transform_9, window_bounds = array<i64: 32, 64>}, {pipeline_mode = #tpu.pipeline_mode<synchronous>, transform_indices = @transform_10, window_bounds = array<i64: 1, 64>}, {pipeline_mode = #tpu.pipeline_mode<synchronous>, transform_indices = @transform_11, window_bounds = array<i64: 64, 32>}, {pipeline_mode = #tpu.pipeline_mode<synchronous>, transform_indices = @transform_12, window_bounds = array<i64: 1, 32>}, {transform_indices = @transform_13, window_bounds = array<i64: 1, 8, 32>}]} {
    %c0 = arith.constant 0 : index
    %c0_0 = arith.constant 0 : index
    %c0_1 = arith.constant 0 : index
    %0 = vector.load %arg1[%c0, %c0_0, %c0_1] : memref<1x8x32xf32, #tpu.memory_space<vmem>>, vector<1x8x32xf32>
    %1 = vector.shape_cast %0 : vector<1x8x32xf32> to vector<8x32xf32>
    %2 = tpu.iota {dimensions = array<i32: 0>} : vector<8x8xi32>
    %3 = tpu.iota {dimensions = array<i32: 1>} : vector<8x8xi32>
    %4 = arith.cmpi sle, %3, %2 : vector<8x8xi32>
    %cst = arith.constant 0.000000e+00 : f32
    %cst_2 = arith.constant -1.000000e+30 : f32
    %5 = vector.broadcast %cst : f32 to vector<8x8xf32>
    %6 = vector.broadcast %cst_2 : f32 to vector<8x8xf32>
    %7 = arith.select %4, %5, %6 : vector<8x8xi1>, vector<8x8xf32>
    %c0_3 = arith.constant 0 : index
    %c0_4 = arith.constant 0 : index
    %8 = vector.load %arg2[%c0_3, %c0_4] : memref<1x32xf32, #tpu.memory_space<vmem>>, vector<1x32xf32>
    %9 = vector.shape_cast %8 : vector<1x32xf32> to vector<32xf32>
    %c0_5 = arith.constant 0 : index
    %c0_6 = arith.constant 0 : index
    %10 = vector.load %arg3[%c0_5, %c0_6] : memref<1x32xf32, #tpu.memory_space<vmem>>, vector<1x32xf32>
    %11 = vector.shape_cast %10 : vector<1x32xf32> to vector<32xf32>
    %cst_7 = arith.constant dense<0.000000e+00> : vector<8xf32>
    %12 = vector.multi_reduction <add>, %1, %cst_7 [1] : vector<8x32xf32> to vector<8xf32>
    %13 = vector.shape_cast %12 : vector<8xf32> to vector<8x1xf32>
    %cst_8 = arith.constant 3.200000e+01 : f32
    %14 = vector.broadcast %cst_8 : f32 to vector<8x1xf32>
    %15 = arith.divf %13, %14 : vector<8x1xf32>
    %16 = vector.broadcast %15 : vector<8x1xf32> to vector<8x32xf32>
    %17 = arith.subf %1, %16 : vector<8x32xf32>
    %18 = arith.mulf %17, %17 : vector<8x32xf32>
    %cst_9 = arith.constant dense<0.000000e+00> : vector<8xf32>
    %19 = vector.multi_reduction <add>, %18, %cst_9 [1] : vector<8x32xf32> to vector<8xf32>
    %20 = vector.shape_cast %19 : vector<8xf32> to vector<8x1xf32>
    %cst_10 = arith.constant 3.200000e+01 : f32
    %21 = vector.broadcast %cst_10 : f32 to vector<8x1xf32>
    %22 = arith.divf %20, %21 : vector<8x1xf32>
    %23 = vector.broadcast %15 : vector<8x1xf32> to vector<8x32xf32>
    %24 = arith.subf %1, %23 : vector<8x32xf32>
    %cst_11 = arith.constant 9.99999974E-6 : f32
    %25 = vector.broadcast %cst_11 : f32 to vector<8x1xf32>
    %26 = arith.addf %22, %25 : vector<8x1xf32>
    %27 = math.rsqrt %26 : vector<8x1xf32>
    %28 = vector.broadcast %27 : vector<8x1xf32> to vector<8x32xf32>
    %29 = arith.mulf %24, %28 : vector<8x32xf32>
    %30 = vector.shape_cast %9 : vector<32xf32> to vector<1x32xf32>
    %31 = vector.broadcast %30 : vector<1x32xf32> to vector<8x32xf32>
    %32 = arith.mulf %29, %31 : vector<8x32xf32>
    %33 = vector.shape_cast %11 : vector<32xf32> to vector<1x32xf32>
    %34 = vector.broadcast %33 : vector<1x32xf32> to vector<8x32xf32>
    %35 = arith.addf %32, %34 : vector<8x32xf32>
    %36 = arith.truncf %35 : vector<8x32xf32> to vector<8x32xbf16>
    %c0_12 = arith.constant 0 : index
    %c0_13 = arith.constant 0 : index
    %37 = vector.load %arg4[%c0_12, %c0_13] : memref<32x96xbf16, #tpu.memory_space<vmem>>, vector<32x96xbf16>
    %cst_14 = arith.constant dense<0.000000e+00> : vector<8x96xf32>
    %38 = tpu.matmul %36, %37, %cst_14 {dimension_numbers = #tpu.dot_dimension_numbers<[1], [0], [0], [1], [0, 0, 1, 1], [], []>} : vector<8x32xbf16>, vector<32x96xbf16>, vector<8x96xf32> -> vector<8x96xf32>
    %c0_15 = arith.constant 0 : index
    %c0_16 = arith.constant 0 : index
    %39 = vector.load %arg5[%c0_15, %c0_16] : memref<1x96xf32, #tpu.memory_space<vmem>>, vector<1x96xf32>
    %40 = vector.shape_cast %39 : vector<1x96xf32> to vector<96xf32>
    %41 = vector.shape_cast %40 : vector<96xf32> to vector<1x96xf32>
    %42 = vector.broadcast %41 : vector<1x96xf32> to vector<8x96xf32>
    %43 = arith.addf %38, %42 : vector<8x96xf32>
    %44 = arith.truncf %43 : vector<8x96xf32> to vector<8x96xbf16>
    %45 = vector.extract_strided_slice %44 {offsets = [0, 0], sizes = [8, 8], strides = [1, 1]} : vector<8x96xbf16> to vector<8x8xbf16>
    %46 = vector.extract_strided_slice %44 {offsets = [0, 8], sizes = [8, 8], strides = [1, 1]} : vector<8x96xbf16> to vector<8x8xbf16>
    %47 = vector.extract_strided_slice %44 {offsets = [0, 16], sizes = [8, 8], strides = [1, 1]} : vector<8x96xbf16> to vector<8x8xbf16>
    %48 = vector.extract_strided_slice %44 {offsets = [0, 24], sizes = [8, 8], strides = [1, 1]} : vector<8x96xbf16> to vector<8x8xbf16>
    %49 = vector.shape_cast %45 : vector<8x8xbf16> to vector<1x8x8xbf16>
    %50 = vector.shape_cast %46 : vector<8x8xbf16> to vector<1x8x8xbf16>
    %51 = vector.shape_cast %47 : vector<8x8xbf16> to vector<1x8x8xbf16>
    %52 = vector.shape_cast %48 : vector<8x8xbf16> to vector<1x8x8xbf16>
    %53 = tpu.concatenate %49, %50, %51, %52 in 0 : vector<1x8x8xbf16>, vector<1x8x8xbf16>, vector<1x8x8xbf16>, vector<1x8x8xbf16> -> vector<4x8x8xbf16>
    %54 = vector.extract_strided_slice %44 {offsets = [0, 64], sizes = [8, 8], strides = [1, 1]} : vector<8x96xbf16> to vector<8x8xbf16>
    %55 = vector.extract_strided_slice %44 {offsets = [0, 72], sizes = [8, 8], strides = [1, 1]} : vector<8x96xbf16> to vector<8x8xbf16>
    %56 = vector.extract_strided_slice %44 {offsets = [0, 80], sizes = [8, 8], strides = [1, 1]} : vector<8x96xbf16> to vector<8x8xbf16>
    %57 = vector.extract_strided_slice %44 {offsets = [0, 88], sizes = [8, 8], strides = [1, 1]} : vector<8x96xbf16> to vector<8x8xbf16>
    %58 = vector.shape_cast %54 : vector<8x8xbf16> to vector<1x8x8xbf16>
    %59 = vector.shape_cast %55 : vector<8x8xbf16> to vector<1x8x8xbf16>
    %60 = vector.shape_cast %56 : vector<8x8xbf16> to vector<1x8x8xbf16>
    %61 = vector.shape_cast %57 : vector<8x8xbf16> to vector<1x8x8xbf16>
    %62 = tpu.concatenate %58, %59, %60, %61 in 0 : vector<1x8x8xbf16>, vector<1x8x8xbf16>, vector<1x8x8xbf16>, vector<1x8x8xbf16> -> vector<4x8x8xbf16>
    %63 = vector.extract_strided_slice %44 {offsets = [0, 32], sizes = [8, 32], strides = [1, 1]} : vector<8x96xbf16> to vector<8x32xbf16>
    %64 = tpu.transpose %63, [1, 0] : vector<8x32xbf16> -> vector<32x8xbf16>
    %65 = vector.extract_strided_slice %64 {offsets = [0, 0], sizes = [8, 8], strides = [1, 1]} : vector<32x8xbf16> to vector<8x8xbf16>
    %66 = vector.extract_strided_slice %64 {offsets = [8, 0], sizes = [8, 8], strides = [1, 1]} : vector<32x8xbf16> to vector<8x8xbf16>
    %67 = vector.extract_strided_slice %64 {offsets = [16, 0], sizes = [8, 8], strides = [1, 1]} : vector<32x8xbf16> to vector<8x8xbf16>
    %68 = vector.extract_strided_slice %64 {offsets = [24, 0], sizes = [8, 8], strides = [1, 1]} : vector<32x8xbf16> to vector<8x8xbf16>
    %69 = vector.shape_cast %65 : vector<8x8xbf16> to vector<1x8x8xbf16>
    %70 = vector.shape_cast %66 : vector<8x8xbf16> to vector<1x8x8xbf16>
    %71 = vector.shape_cast %67 : vector<8x8xbf16> to vector<1x8x8xbf16>
    %72 = vector.shape_cast %68 : vector<8x8xbf16> to vector<1x8x8xbf16>
    %73 = tpu.concatenate %69, %70, %71, %72 in 0 : vector<1x8x8xbf16>, vector<1x8x8xbf16>, vector<1x8x8xbf16>, vector<1x8x8xbf16> -> vector<4x8x8xbf16>
    "tpu.trace_start"() <{level = 10 : i32, message = "hqd,hdk->hqk"}> : () -> ()
    %cst_17 = arith.constant dense<0.000000e+00> : vector<4x8x8xf32>
    %74 = tpu.matmul %53, %73, %cst_17 {dimension_numbers = #tpu.dot_dimension_numbers<[2], [1], [1], [2], [0, 0, 0, 1, 1, 2], [0], [0]>} : vector<4x8x8xbf16>, vector<4x8x8xbf16>, vector<4x8x8xf32> -> vector<4x8x8xf32>
    "tpu.trace_stop"() : () -> ()
    %75 = vector.shape_cast %7 : vector<8x8xf32> to vector<1x8x8xf32>
    %76 = vector.broadcast %75 : vector<1x8x8xf32> to vector<4x8x8xf32>
    %77 = arith.addf %74, %76 : vector<4x8x8xf32>
    %cst_18 = arith.constant dense<0xFF800000> : vector<4x8xf32>
    %78 = vector.multi_reduction <maximumf>, %77, %cst_18 [2] : vector<4x8x8xf32> to vector<4x8xf32>
    %79 = vector.shape_cast %78 : vector<4x8xf32> to vector<4x8x1xf32>
    %80 = vector.broadcast %79 : vector<4x8x1xf32> to vector<4x8x8xf32>
    %81 = arith.subf %77, %80 : vector<4x8x8xf32>
    %82 = math.exp %81 : vector<4x8x8xf32>
    %cst_19 = arith.constant dense<0.000000e+00> : vector<4x8xf32>
    %83 = vector.multi_reduction <add>, %82, %cst_19 [2] : vector<4x8x8xf32> to vector<4x8xf32>
    %84 = vector.shape_cast %83 : vector<4x8xf32> to vector<4x8x1xf32>
    %85 = tpu.reciprocal %84 {approx = true} : vector<4x8x1xf32> -> vector<4x8x1xf32>
    %86 = vector.broadcast %85 : vector<4x8x1xf32> to vector<4x8x8xf32>
    %87 = arith.mulf %82, %86 : vector<4x8x8xf32>
    %88 = arith.truncf %87 : vector<4x8x8xf32> to vector<4x8x8xbf16>
    "tpu.trace_start"() <{level = 10 : i32, message = "hqk,hkd->hqd"}> : () -> ()
    %cst_20 = arith.constant dense<0.000000e+00> : vector<4x8x8xf32>
    %89 = tpu.matmul %88, %62, %cst_20 {dimension_numbers = #tpu.dot_dimension_numbers<[2], [1], [1], [2], [0, 0, 0, 1, 1, 2], [0], [0]>} : vector<4x8x8xbf16>, vector<4x8x8xbf16>, vector<4x8x8xf32> -> vector<4x8x8xf32>
    "tpu.trace_stop"() : () -> ()
    %90 = arith.truncf %89 : vector<4x8x8xf32> to vector<4x8x8xbf16>
    %91 = vector.extract_strided_slice %90 {offsets = [0, 0, 0], sizes = [1, 8, 8], strides = [1, 1, 1]} : vector<4x8x8xbf16> to vector<1x8x8xbf16>
    %92 = vector.shape_cast %91 : vector<1x8x8xbf16> to vector<8x8xbf16>
    %93 = vector.extract_strided_slice %90 {offsets = [1, 0, 0], sizes = [1, 8, 8], strides = [1, 1, 1]} : vector<4x8x8xbf16> to vector<1x8x8xbf16>
    %94 = vector.shape_cast %93 : vector<1x8x8xbf16> to vector<8x8xbf16>
    %95 = vector.extract_strided_slice %90 {offsets = [2, 0, 0], sizes = [1, 8, 8], strides = [1, 1, 1]} : vector<4x8x8xbf16> to vector<1x8x8xbf16>
    %96 = vector.shape_cast %95 : vector<1x8x8xbf16> to vector<8x8xbf16>
    %97 = vector.extract_strided_slice %90 {offsets = [3, 0, 0], sizes = [1, 8, 8], strides = [1, 1, 1]} : vector<4x8x8xbf16> to vector<1x8x8xbf16>
    %98 = vector.shape_cast %97 : vector<1x8x8xbf16> to vector<8x8xbf16>
    %99 = tpu.concatenate %92, %94, %96, %98 in 1 : vector<8x8xbf16>, vector<8x8xbf16>, vector<8x8xbf16>, vector<8x8xbf16> -> vector<8x32xbf16>
    %c0_21 = arith.constant 0 : index
    %c0_22 = arith.constant 0 : index
    %100 = vector.load %arg6[%c0_21, %c0_22] : memref<32x32xbf16, #tpu.memory_space<vmem>>, vector<32x32xbf16>
    %cst_23 = arith.constant dense<0.000000e+00> : vector<8x32xf32>
    %101 = tpu.matmul %99, %100, %cst_23 {dimension_numbers = #tpu.dot_dimension_numbers<[1], [0], [0], [1], [0, 0, 1, 1], [], []>} : vector<8x32xbf16>, vector<32x32xbf16>, vector<8x32xf32> -> vector<8x32xf32>
    %c0_24 = arith.constant 0 : index
    %c0_25 = arith.constant 0 : index
    %102 = vector.load %arg7[%c0_24, %c0_25] : memref<1x32xf32, #tpu.memory_space<vmem>>, vector<1x32xf32>
    %103 = vector.shape_cast %102 : vector<1x32xf32> to vector<32xf32>
    %104 = vector.shape_cast %103 : vector<32xf32> to vector<1x32xf32>
    %105 = vector.broadcast %104 : vector<1x32xf32> to vector<8x32xf32>
    %106 = arith.addf %101, %105 : vector<8x32xf32>
    %107 = arith.addf %1, %106 : vector<8x32xf32>
    %c0_26 = arith.constant 0 : index
    %c0_27 = arith.constant 0 : index
    %108 = vector.load %arg8[%c0_26, %c0_27] : memref<1x32xf32, #tpu.memory_space<vmem>>, vector<1x32xf32>
    %109 = vector.shape_cast %108 : vector<1x32xf32> to vector<32xf32>
    %c0_28 = arith.constant 0 : index
    %c0_29 = arith.constant 0 : index
    %110 = vector.load %arg9[%c0_28, %c0_29] : memref<1x32xf32, #tpu.memory_space<vmem>>, vector<1x32xf32>
    %111 = vector.shape_cast %110 : vector<1x32xf32> to vector<32xf32>
    %cst_30 = arith.constant dense<0.000000e+00> : vector<8xf32>
    %112 = vector.multi_reduction <add>, %107, %cst_30 [1] : vector<8x32xf32> to vector<8xf32>
    %113 = vector.shape_cast %112 : vector<8xf32> to vector<8x1xf32>
    %cst_31 = arith.constant 3.200000e+01 : f32
    %114 = vector.broadcast %cst_31 : f32 to vector<8x1xf32>
    %115 = arith.divf %113, %114 : vector<8x1xf32>
    %116 = vector.broadcast %115 : vector<8x1xf32> to vector<8x32xf32>
    %117 = arith.subf %107, %116 : vector<8x32xf32>
    %118 = arith.mulf %117, %117 : vector<8x32xf32>
    %cst_32 = arith.constant dense<0.000000e+00> : vector<8xf32>
    %119 = vector.multi_reduction <add>, %118, %cst_32 [1] : vector<8x32xf32> to vector<8xf32>
    %120 = vector.shape_cast %119 : vector<8xf32> to vector<8x1xf32>
    %cst_33 = arith.constant 3.200000e+01 : f32
    %121 = vector.broadcast %cst_33 : f32 to vector<8x1xf32>
    %122 = arith.divf %120, %121 : vector<8x1xf32>
    %123 = vector.broadcast %115 : vector<8x1xf32> to vector<8x32xf32>
    %124 = arith.subf %107, %123 : vector<8x32xf32>
    %cst_34 = arith.constant 9.99999974E-6 : f32
    %125 = vector.broadcast %cst_34 : f32 to vector<8x1xf32>
    %126 = arith.addf %122, %125 : vector<8x1xf32>
    %127 = math.rsqrt %126 : vector<8x1xf32>
    %128 = vector.broadcast %127 : vector<8x1xf32> to vector<8x32xf32>
    %129 = arith.mulf %124, %128 : vector<8x32xf32>
    %130 = vector.shape_cast %109 : vector<32xf32> to vector<1x32xf32>
    %131 = vector.broadcast %130 : vector<1x32xf32> to vector<8x32xf32>
    %132 = arith.mulf %129, %131 : vector<8x32xf32>
    %133 = vector.shape_cast %111 : vector<32xf32> to vector<1x32xf32>
    %134 = vector.broadcast %133 : vector<1x32xf32> to vector<8x32xf32>
    %135 = arith.addf %132, %134 : vector<8x32xf32>
    %136 = arith.truncf %135 : vector<8x32xf32> to vector<8x32xbf16>
    %c0_35 = arith.constant 0 : index
    %c0_36 = arith.constant 0 : index
    %137 = vector.load %arg10[%c0_35, %c0_36] : memref<32x64xbf16, #tpu.memory_space<vmem>>, vector<32x64xbf16>
    %cst_37 = arith.constant dense<0.000000e+00> : vector<8x64xf32>
    %138 = tpu.matmul %136, %137, %cst_37 {dimension_numbers = #tpu.dot_dimension_numbers<[1], [0], [0], [1], [0, 0, 1, 1], [], []>} : vector<8x32xbf16>, vector<32x64xbf16>, vector<8x64xf32> -> vector<8x64xf32>
    %c0_38 = arith.constant 0 : index
    %c0_39 = arith.constant 0 : index
    %139 = vector.load %arg11[%c0_38, %c0_39] : memref<1x64xf32, #tpu.memory_space<vmem>>, vector<1x64xf32>
    %140 = vector.shape_cast %139 : vector<1x64xf32> to vector<64xf32>
    %141 = vector.shape_cast %140 : vector<64xf32> to vector<1x64xf32>
    %142 = vector.broadcast %141 : vector<1x64xf32> to vector<8x64xf32>
    %143 = arith.addf %138, %142 : vector<8x64xf32>
    %cst_40 = arith.constant 0.000000e+00 : f32
    %144 = vector.broadcast %cst_40 : f32 to vector<8x64xf32>
    %145 = arith.maximumf %143, %144 : vector<8x64xf32>
    %146 = arith.truncf %145 : vector<8x64xf32> to vector<8x64xbf16>
    %c0_41 = arith.constant 0 : index
    %c0_42 = arith.constant 0 : index
    %147 = vector.load %arg12[%c0_41, %c0_42] : memref<64x32xbf16, #tpu.memory_space<vmem>>, vector<64x32xbf16>
    %cst_43 = arith.constant dense<0.000000e+00> : vector<8x32xf32>
    %148 = tpu.matmul %146, %147, %cst_43 {dimension_numbers = #tpu.dot_dimension_numbers<[1], [0], [0], [1], [0, 0, 1, 1], [], []>} : vector<8x64xbf16>, vector<64x32xbf16>, vector<8x32xf32> -> vector<8x32xf32>
    %c0_44 = arith.constant 0 : index
    %c0_45 = arith.constant 0 : index
    %149 = vector.load %arg13[%c0_44, %c0_45] : memref<1x32xf32, #tpu.memory_space<vmem>>, vector<1x32xf32>
    %150 = vector.shape_cast %149 : vector<1x32xf32> to vector<32xf32>
    %151 = vector.shape_cast %150 : vector<32xf32> to vector<1x32xf32>
    %152 = vector.broadcast %151 : vector<1x32xf32> to vector<8x32xf32>
    %153 = arith.addf %148, %152 : vector<8x32xf32>
    %154 = arith.addf %107, %153 : vector<8x32xf32>
    %c0_46 = arith.constant 0 : index
    %c0_47 = arith.constant 0 : index
    %c0_48 = arith.constant 0 : index
    %155 = vector.load %arg14[%c0_46, %c0_47, %c0_48] : memref<1x8x32xf32, #tpu.memory_space<vmem>>, vector<1x8x32xf32>
    %156 = vector.shape_cast %155 : vector<1x8x32xf32> to vector<8x32xf32>
    %157 = vector.shape_cast %154 : vector<8x32xf32> to vector<1x8x32xf32>
    tpu.vector_store %arg14[%c0_46, %c0_47, %c0_48], %157 {strides = array<i32>} : memref<1x8x32xf32, #tpu.memory_space<vmem>>, vector<1x8x32xf32>,
    return
  }
  func.func @transform_0(%arg0: i32) -> (i32, i32, i32) {
    %c0_i32 = arith.constant 0 : i32
    %c0_i32_0 = arith.constant 0 : i32
    %c0_i32_1 = arith.constant 0 : i32
    return %arg0, %c0_i32, %c0_i32_0 : i32, i32, i32
  }
  func.func @transform_1(%arg0: i32) -> (i32, i32) {
    %c0_i32 = arith.constant 0 : i32
    %c0_i32_0 = arith.constant 0 : i32
    %c0_i32_1 = arith.constant 0 : i32
    return %c0_i32, %c0_i32_0 : i32, i32
  }
  func.func @transform_2(%arg0: i32) -> (i32, i32) {
    %c0_i32 = arith.constant 0 : i32
    %c0_i32_0 = arith.constant 0 : i32
    %c0_i32_1 = arith.constant 0 : i32
    return %c0_i32, %c0_i32_0 : i32, i32
  }
  func.func @transform_3(%arg0: i32) -> (i32, i32) {
    %c0_i32 = arith.constant 0 : i32
    %c0_i32_0 = arith.constant 0 : i32
    %c0_i32_1 = arith.constant 0 : i32
    return %c0_i32, %c0_i32_0 : i32, i32
  }
  func.func @transform_4(%arg0: i32) -> (i32, i32) {
    %c0_i32 = arith.constant 0 : i32
    %c0_i32_0 = arith.constant 0 : i32
    %c0_i32_1 = arith.constant 0 : i32
    return %c0_i32, %c0_i32_0 : i32, i32
  }
  func.func @transform_5(%arg0: i32) -> (i32, i32) {
    %c0_i32 = arith.constant 0 : i32
    %c0_i32_0 = arith.constant 0 : i32
    %c0_i32_1 = arith.constant 0 : i32
    return %c0_i32, %c0_i32_0 : i32, i32
  }
  func.func @transform_6(%arg0: i32) -> (i32, i32) {
    %c0_i32 = arith.constant 0 : i32
    %c0_i32_0 = arith.constant 0 : i32
    %c0_i32_1 = arith.constant 0 : i32
    return %c0_i32, %c0_i32_0 : i32, i32
  }
  func.func @transform_7(%arg0: i32) -> (i32, i32) {
    %c0_i32 = arith.constant 0 : i32
    %c0_i32_0 = arith.constant 0 : i32
    %c0_i32_1 = arith.constant 0 : i32
    return %c0_i32, %c0_i32_0 : i32, i32
  }
  func.func @transform_8(%arg0: i32) -> (i32, i32) {
    %c0_i32 = arith.constant 0 : i32
    %c0_i32_0 = arith.constant 0 : i32
    %c0_i32_1 = arith.constant 0 : i32
    return %c0_i32, %c0_i32_0 : i32, i32
  }
  func.func @transform_9(%arg0: i32) -> (i32, i32) {
    %c0_i32 = arith.constant 0 : i32
    %c0_i32_0 = arith.constant 0 : i32
    %c0_i32_1 = arith.constant 0 : i32
    return %c0_i32, %c0_i32_0 : i32, i32
  }
  func.func @transform_10(%arg0: i32) -> (i32, i32) {
    %c0_i32 = arith.constant 0 : i32
    %c0_i32_0 = arith.constant 0 : i32
    %c0_i32_1 = arith.constant 0 : i32
    return %c0_i32, %c0_i32_0 : i32, i32
  }
  func.func @transform_11(%arg0: i32) -> (i32, i32) {
    %c0_i32 = arith.constant 0 : i32
    %c0_i32_0 = arith.constant 0 : i32
    %c0_i32_1 = arith.constant 0 : i32
    return %c0_i32, %c0_i32_0 : i32, i32
  }
  func.func @transform_12(%arg0: i32) -> (i32, i32) {
    %c0_i32 = arith.constant 0 : i32
    %c0_i32_0 = arith.constant 0 : i32
    %c0_i32_1 = arith.constant 0 : i32
    return %c0_i32, %c0_i32_0 : i32, i32
  }
  func.func @transform_13(%arg0: i32) -> (i32, i32, i32) {
    %c0_i32 = arith.constant 0 : i32
    %c0_i32_0 = arith.constant 0 : i32
    %c0_i32_1 = arith.constant 0 : i32
    return %arg0, %c0_i32, %c0_i32_0 : i32, i32, i32
  }
}

</mosaic_0001>

<bundles_post_ra>
// kernel: tpu_custom_call.1
= control target key start
LH: loop header
LB: loop body
LE: loop exit
PB: predicated region body
PF: predicated region fallthrough
CT: control target
= control target key end

     0   :  { %s2360_s0 = inlined_call_operand.vmem [shape: f32[2,8,32], index: 0, kind: input, shape index: {}]   ;;  %s2361_s1 = inlined_call_operand.vmem [shape: f32[1,32], index: 1, kind: input, shape index: {}]   ;;  %s2362_s2 = inlined_call_operand.vmem [shape: f32[1,32], index: 2, kind: input, shape index: {}]   ;;  %s2363_s3 = inlined_call_operand.vmem [shape: bf16[32,96], index: 3, kind: input, shape index: {}]   ;;  %s2364_s4 = inlined_call_operand.hbm [shape: f32[1,96], index: 4, kind: input, shape index: {}]   ;;  %s2365_s5 = inlined_call_operand.vmem [shape: bf16[32,32], index: 5, kind: input, shape index: {}]   ;;  %s2366_s6 = inlined_call_operand.hbm [shape: f32[1,32], index: 6, kind: input, shape index: {}]   ;;  %s2367_s7 = inlined_call_operand.hbm [shape: f32[1,32], index: 7, kind: input, shape index: {}]   ;;  %s2368_s8 = inlined_call_operand.hbm [shape: f32[1,32], index: 8, kind: input, shape index: {}]   ;;  %s2369_s9 = inlined_call_operand.vmem [shape: bf16[32,64], index: 9, kind: input, shape index: {}]   ;;  %s2370_s10 = inlined_call_operand.vmem [shape: f32[1,64], index: 10, kind: input, shape index: {}]   ;;  %s2371_s11 = inlined_call_operand.vmem [shape: bf16[64,32], index: 11, kind: input, shape index: {}]   ;;  %s2372_s12 = inlined_call_operand.vmem [shape: f32[1,32], index: 12, kind: input, shape index: {}]   ;;  %s2373_s13 = inlined_call_operand.hbm [shape: f32[2,8,32], index: 13, kind: output, shape index: {}]  }
   0x1   :  { %2384 = sst [smem:[#allocation21_spill]] %s2373_s13 }
   0x2   :  { %18 = vsyncpa [#allocation3], 0 }
   0x3   :  { %19 = vsyncpa [#allocation6], 0 }
   0x4   :  { %20 = vsyncpa [#allocation9], 0 }
   0x5   :  { %21 = vsyncpa [#allocation4], 0 }
   0x6   :  { %23 = vsyncpa [#allocation4 + $0x1], 0  ;;  %s1993_s25 = smov 0   ;;  %s1995_s26 = smov 0  }
   0x7   :  { %s1997_s27 = smov 0   ;;  %s1999_s28 = smov 0  }
   0x8 LB: > { %2385 = sst [smem:[#allocation15_spill]] %s1893_s25  ;;  %s2014_s29 = sadd.s32 4294967295, %s1905_s28   ;;  %s1905_s28 = sphi %s1999_s28, %s2410_s28   ;;  %s1901_s27 = sphi %s1997_s27, %s2412_s27   ;;  %s1897_s26 = sphi %s1995_s26, %s2414_s26   ;;  %s1893_s25 = sphi %s1993_s25, %s2413_s25  }
   0x9   : > { %2386 = sst [smem:[#allocation16_spill]] %s1901_s27  ;;  %s1435_s30 = sadd.s32 4294967294, %s1905_s28  }
   0xa   : > { %2387 = sst [smem:[#allocation17_spill]] %s1905_s28  ;;  %s2018_s14 = sadd.s32 1, %s1905_s28  }
   0xb   : > { %2388 = sst [smem:[#allocation18_spill]] %s2018_s14  ;;  %s314_s15 = sadd.s32 1, %s1901_s27 }
   0xc   : > { %s311_s16 = ssub.s32 %s1905_s28, %s2018_s14  ;;  %p324_p0 = scmp.ne.s32.totalorder %s1901_s27, %s1897_s26 }
   0xd   : > { %p312_p1 = scmp.eq.s32.totalorder %s311_s16, 0  ;;  %p325_p2 = scmp.eq.s32.totalorder %s2014_s29, 1 }
   0xe   : > { %p330_p3 = scmp.ne.s32.totalorder %s1897_s26, %s1893_s25  ;;  %p331_p4 = scmp.eq.s32.totalorder %s1435_s30, 1 }
   0xf   : > { %s2029_s17 = scalar_select %p312_p1, %s1901_s27, %s314_s15  }
  0x10   : > { %p2031_p5 = por %p325_p2, %p324_p0  ;;  %p2035_p6 = por %p331_p4, %p330_p3 }
  0x11   : > { %2389 = sst [smem:[#allocation19_spill]] %s2029_s17  ;;  %p1436_p7 = scmp.ge.s32.totalorder %s1905_s28, 1 }
  0x12   : > { %s2390_s18 = scalar_select %p2031_p5, 1, 0 }
  0x13   : > { %s2391_s19 = scalar_select %p2035_p6, 1, 0 }
  0x14   : > { %p338_p8 = scmp.lt.s32.totalorder %s1905_s28, 3  ;;  %p2379_p9 = scmp.eq.s32.totalorder %s2014_s29, 0 }
  0x15   : > { %2392 = sst [smem:[#allocation20_spill]] %s2391_s19  ;;  %s1907_s21 = smov [#allocation5]  }
  0x16   : > { %p2042_p10 = pnand %p1436_p7, %p338_p8  ;;  %s374_s22 = sshll.u32 %s1907_s21, 4  ;;  %s375_s22 = int_to_ptr.vmem [resolvable:$true] %s374_s22 }
  0x17   : > { %s1908_s23 = smov [#allocation2]   ;;  %s1909_s15 = smov [#allocation7]  }
  0x18   : > { %s2393_s20 = scalar_select %p2042_p10, 1, 0 }
  0x19   : > { %p1615_p11 = pneg %p2042_p10  ;;  %s360_s24 = sshll.u32 %s1908_s23, 4  ;;  %s2054_s24 = int_to_ptr.vmem [resolvable:$true] %s360_s24 }
  0x1a   : > { %s385_s16 = sshll.u32 %s1909_s15, 4  ;;  %s1719_s21 = scalar_lea.hbm %s2366_s6, 16  ;;  %s2056_s16 = int_to_ptr.vmem [resolvable:$true] %s385_s16 }
  0x1b   : > { %p2050_p12 = pnand %p2379_p9, %p1615_p11  ;;  %p1720_p13 = scmp.ne.s32.totalorder %s2366_s6, %s1719_s21 }
  0x1c   : > { %p1726_p3 = scmp.lt.u32.totalorder %s1719_s21, %s2366_s6 }
  0x1d   : > { %p2066_p0 = pneg %p2050_p12 }
  0x1f   : > { %p1722_p1 = pnand %p2066_p0, %p1720_p13 }
  0x21   : > { %p1723_p2 = pneg %p1722_p1 }
  0x23   : > { %p1728_p4 = pnand %p1726_p3, %p1723_p2 }
  0x25   : > { %1731 = shalt.err (!%p1728_p4)
}
  0x26   : > { %s1732_s27 = scalar_lea.vmem %s375_s22, 16  ;;  %s1739_s14 = scalar_lea.vmem %s375_s22, 32 }
  0x27   : > { %p1733_p7 = scmp.ne.s32.totalorder %s375_s22, %s1732_s27  ;;  %p1740_p9 = scmp.lt.s32.totalorder %s375_s22, %s375_s22 }
  0x28   : > { %p1741_p6 = scmp.lt.s32.totalorder %s1739_s14, %s1732_s27 }
  0x29   : > { %p1735_p8 = pnand %p1733_p7, %p2066_p0 }
  0x2a   : > { %p1742_p5 = por %p1741_p6, %p1740_p9 }
  0x2b   : > { %p1736_p11 = pneg %p1735_p8 }
  0x2d   : > { %p1743_p10 = pnand %p1742_p5, %p1736_p11 }
  0x2f   : > { %1746 = shalt.err (!%p1743_p10)
}
  0x30   : > { %1621 = dma.hbm_to_vmem [thread:$0]  (!%p2050_p12), %s2366_s6, 16, %s375_s22, [#allocation6]  }
  0x31   : > { %s1747_s15 = scalar_lea.hbm %s2364_s4, 16 }
  0x32   : > { %p1748_p13 = scmp.ne.s32.totalorder %s2364_s4, %s1747_s15  ;;  %p1754_p5 = scmp.lt.u32.totalorder %s1747_s15, %s2364_s4 }
  0x34   : > { %p1750_p1 = pnand %p1748_p13, %p2066_p0 }
  0x36   : > { %p1751_p6 = pneg %p1750_p1 }
  0x38   : > { %p1756_p9 = pnand %p1754_p5, %p1751_p6 }
  0x3a   : > { %1759 = shalt.err (!%p1756_p9)
}
  0x3b   : > { %s1760_s22 = scalar_lea.vmem %s2054_s24, 16  ;;  %s1767_s13 = scalar_lea.vmem %s2054_s24, 32 }
  0x3c   : > { %p1761_p10 = scmp.ne.s32.totalorder %s2054_s24, %s1760_s22  ;;  %p1768_p4 = scmp.lt.s32.totalorder %s2054_s24, %s2054_s24 }
  0x3d   : > { %p1769_p7 = scmp.lt.s32.totalorder %s1767_s13, %s1760_s22 }
  0x3e   : > { %p1763_p2 = pnand %p1761_p10, %p2066_p0 }
  0x3f   : > { %p1770_p8 = por %p1769_p7, %p1768_p4 }
  0x40   : > { %p1764_p3 = pneg %p1763_p2 }
  0x42   : > { %p1771_p11 = pnand %p1770_p8, %p1764_p3 }
  0x44   : > { %1774 = shalt.err (!%p1771_p11)
}
  0x45   : > { %1618 = dma.hbm_to_vmem [thread:$0]  (!%p2050_p12), %s2364_s4, 16, %s2054_s24, [#allocation3]  }
  0x46   : > { %s1775_s21 = scalar_lea.hbm %s2367_s7, 16 }
  0x47   : > { %p1776_p13 = scmp.ne.s32.totalorder %s2367_s7, %s1775_s21  ;;  %p1782_p5 = scmp.lt.u32.totalorder %s1775_s21, %s2367_s7 }
  0x49   : > { %p1778_p1 = pnand %p1776_p13, %p2066_p0 }
  0x4b   : > { %p1779_p6 = pneg %p1778_p1 }
  0x4d   : > { %p1784_p9 = pnand %p1782_p5, %p1779_p6 }
  0x4f   : > { %1787 = shalt.err (!%p1784_p9)
}
  0x50   : > { %s1788_s24 = scalar_lea.vmem %s2056_s16, 16  ;;  %s1795_s13 = scalar_lea.vmem %s2056_s16, 32 }
  0x51   : > { %p1789_p10 = scmp.ne.s32.totalorder %s2056_s16, %s1788_s24  ;;  %p1796_p4 = scmp.lt.s32.totalorder %s2056_s16, %s2056_s16 }
  0x52   : > { %p1797_p7 = scmp.lt.s32.totalorder %s1795_s13, %s1788_s24 }
  0x53   : > { %p1791_p2 = pnand %p1789_p10, %p2066_p0 }
  0x54   : > { %p1798_p8 = por %p1797_p7, %p1796_p4 }
  0x55   : > { %p1792_p3 = pneg %p1791_p2 }
  0x57   : > { %p1799_p11 = pnand %p1798_p8, %p1792_p3 }
  0x59   : > { %1802 = shalt.err (!%p1799_p11)
}
  0x5a   : > { %1624 = dma.hbm_to_vmem [thread:$0]  (!%p2050_p12), %s2367_s7, 16, %s2056_s16, [#allocation6]  }
  0x5b   : > { %s1910_s19 = smov [#allocation8]   ;;  %s1803_s27 = scalar_lea.hbm %s2368_s8, 16 }
  0x5c   : > { %s396_s25 = sshll.u32 %s1910_s19, 4  ;;  %p1804_p13 = scmp.ne.s32.totalorder %s2368_s8, %s1803_s27  ;;  %s397_s25 = int_to_ptr.vmem [resolvable:$true] %s396_s25 }
  0x5d   : > { %p1810_p5 = scmp.lt.u32.totalorder %s1803_s27, %s2368_s8 }
  0x5e   : > { %p1806_p1 = pnand %p1804_p13, %p2066_p0 }
  0x60   : > { %p1807_p6 = pneg %p1806_p1 }
  0x62   : > { %p1812_p9 = pnand %p1810_p5, %p1807_p6 }
  0x64   : > { %1815 = shalt.err (!%p1812_p9)
}
  0x65   : > { %s1816_s16 = scalar_lea.vmem %s397_s25, 16  ;;  %s1823_s28 = scalar_lea.vmem %s397_s25, 32 }
  0x66   : > { %p1817_p10 = scmp.ne.s32.totalorder %s397_s25, %s1816_s16  ;;  %p1824_p4 = scmp.lt.s32.totalorder %s397_s25, %s397_s25 }
  0x67   : > { %p1825_p7 = scmp.lt.s32.totalorder %s1823_s28, %s1816_s16 }
  0x68   : > { %p1819_p2 = pnand %p1817_p10, %p2066_p0 }
  0x69   : > { %p1826_p8 = por %p1825_p7, %p1824_p4 }
  0x6a   : > { %p1820_p3 = pneg %p1819_p2 }
  0x6c   : > { %p1827_p11 = pnand %p1826_p8, %p1820_p3 }
  0x6e   : > { %1830 = shalt.err (!%p1827_p11)
}
  0x6f   : > { %1627 = dma.hbm_to_vmem [thread:$0]  (!%p2050_p12), %s2368_s8, 16, %s397_s25, [#allocation9]  }
  0x70   : > { %p2396_p13 = scmp.ne.s32.totalorder %s2393_s20, 0 }
  0x71   : > { %p2397_p1 = scmp.eq.s32.totalorder (!%p2396_p13), %s2014_s29, 0 }
  0x72   : > { %428 = sbr.rel (%p2396_p13) target bundleno = 2752 (0xac0), region = 72 }
  0x79   : > { %1876 = dma.done.wait (%p2397_p1), [#allocation3], 16   ;;  %p2398_p0 = pmov %p2397_p1 }
  0x7b   : > { %1878 = vsyncadd (%p2398_p0), [#allocation3], 4294967280  ;;  %p2399_p6 = pmov %p2398_p0 }
  0x7c   : > { %p2400_p5 = pmov %p2398_p0 }
  0x7d   : > { %1880 = dma.done.wait (%p2399_p6), [#allocation6], 32  }
  0x7e   : > { %1882 = vsyncadd (%p2400_p5), [#allocation6], 4294967264  ;;  %p2401_p9 = pmov %p2398_p0 }
  0x7f   : > { %p2402_p12 = pmov %p2398_p0 }
  0x80   : > { %1884 = dma.done.wait (%p2401_p9), [#allocation9], 16  }
  0x81   : > { %1886 = vsyncadd (%p2402_p12), [#allocation9], 4294967280  ;;  %p483_p10 = scmp.lt.s32.totalorder %s2014_s29, 1  ;;  %vm497_vm0 = vcmask 261120   ;;  %v1689_v7 = vld [vmem:[%s2363_s3] sm:$0xff]   ;;  %v1911_v8 = vmov 0.0   ;;  %v489_v39 = vlaneseq }
  0x82   : > { %1513 = vmatprep.subr.bf16.mxu0 %v1911_v8  ;;  %vm1912_vm1 = vmmov 0   ;;  %v1690_v9 = vld [vmem:[%s2363_s3 + $0x8] sm:$0xff]   ;;  %1521 = vmatprep.subr.bf16.mxu1 %v1911_v8  ;;  %v1449_v14 = vld [vmem:[%s2361_s1] ss:$0 sm:$0xff]  ;;  %s1913_s17 = smov 112   ;;  %s1914_s19 = smov 96  }
  0x83   : > { %s484_s20 = scalar_select %p483_p10, %s2014_s29, 1  ;;  %1517 = vmatprep.mubr.msk.bf16.mxu0 %vm1912_vm1, %v1911_v8  ;;  %1514 = vmatpush3.bf16.msra.mxu0 %v1689_v7  ;;  %v1450_v16 = vld [vmem:[%s2362_s2] ss:$0 sm:$0xff]  ;;  %vm628_vm2 = vcmask 1043456   ;;  %vm624_vm3 = vcmask 64512   ;;  %v490_v40 = vshrl.u32 %v489_v39, 7 }
  0x84   : > { %1515 = vmatprep.subr.bf16.mxu0 %v1911_v8  ;;  %1523 = vmatprep.mubr.msk.bf16.mxu1 %vm1912_vm1, %v1911_v8  ;;  %v1451_v20 = vld [vmem:[#allocation2] ss:$0 sm:$0xff]  ;;  %v492_v41 = vand.u32 127, %v489_v39  ;;  %v1917_v42 = vmov -1e+30   ;;  %s1918_s23 = smov 64  }
  0x85   : > { %s1448_s30 = sshll.u32 %s484_s20, 3  ;;  %s1915_s20 = smov 104   ;;  %vm1066_vm5 = vcmask 130048   ;;  %vm1069_vm6 = vcmask 195584   ;;  %vm1275_vm7 = vcmask 523264  }
  0x86   : > { %s486_s21 = scalar_lea.vmem %s2360_s0, %s1448_s30  ;;  %s1916_s30 = smov 120   ;;  %vm493_vm4 = vcmp.le.s32.totalorder %v492_v41, %v490_v40 }
  0x87   : > { %v2167_v0 = vld [vmem:[%s486_s21] sm:$0xff]  ;;  %1516 = vmatpush3.bf16.msra.mxu0 %v1690_v9  ;;  %v494_v43 = vsel %vm493_vm4, 0.0, %v1917_v42  ;;  %s1919_s14 = smov 8   ;;  %s1920_s22 = smov 16  }
  0x88   : > { %v498_v1 = vsel %vm497_vm0, %v2167_v0, 0.0  ;;  %1545 = vmatprep.subr.bf16.mxu0 %v1911_v8  ;;  %s1921_s24 = smov 24   ;;  %s2403_s25 = sld [smem:[#allocation21_spill]] }
  0x89   : > { %499 = vadd.xlane.f32.xlu0 %v498_v1  ;;  %p2405_p3 = scmp.ne.s32.totalorder %s2390_s18, 0 }
  0x8e   : > { %s2404_s21 = smov %s2403_s25 }
 0x116   : > { %v500_v2 = vpop.xlane.xlu0 %499 }
 0x117   : > { %v502_v3 = vmul.f32 0.03125, %v500_v2 }
 0x119   : > { %v503_v4 = vsub.f32 %v2167_v0, %v502_v3 }
 0x11b   : > { %v504_v5 = vmul.f32 %v503_v4, %v503_v4 }
 0x11d   : > { %v505_v6 = vsel %vm497_vm0, %v504_v5, 0.0 }
 0x11e   : > { %506 = vadd.xlane.f32.xlu0 %v505_v6 }
 0x1ab   : > { %v507_v10 = vpop.xlane.xlu0 %506 }
 0x1ac   : > { %v508_v11 = vmul.f32 0.03125, %v507_v10 }
 0x1ae   : > { %v509_v12 = vadd.f32 1e-05, %v508_v11 }
 0x1b0   : > { %1699 = vrsqrt.f32 %v509_v12 }
 0x1ba   : > { %v1700_v13 = vpop.eup %1699 }
 0x1bb   : > { %v511_v15 = vmul.f32 %v1700_v13, %v503_v4 }
 0x1bd   : > { %v518_v17 = vmul.f32 %v1449_v14, %v511_v15 }
 0x1bf   : > { %v525_v18 = vadd.f32 %v1450_v16, %v518_v17 }
 0x1c1   : > { %v526_v19 = vpack.c.bf16 %v525_v18, %v525_v18 }
 0x1c3   : > { %1518 = vmatmul.mubr.msk.bf16.vlgmr.msra.gmra.mrb[0].mxu0 %vm497_vm0, %v526_v19 }
 0x1c4   : > { %1547 = vmatprep.mubr.msk.bf16.mxu0 %vm1912_vm1, %v1911_v8 }
 0x296   : > { %v587_v21 = vpop.f32.mrb[0].mxu0 }
 0x297   : > { %v588_v22 = vadd.f32 %v1451_v20, %v587_v21  ;;  %v1519_v23 = vpop.f32.mrb[1].mxu0 }
 0x298   : > { %v590_v24 = vpop.f32.mrb[2].mxu0 }
 0x299   : > { %v2196_v25 = vpack.c.bf16 %v588_v22, %v588_v22  ;;  %v1520_v26 = vpop.f32.mrb[3].mxu0 }
 0x29b   : > { %597 = vrot.lane.b32.xlu0 %v2196_v25, %s1913_s17  ;;  %601 = vrot.lane.b32.xlu1 %v2196_v25, %s1914_s19  ;;  %s1480_s17 = sshll.u32 %s2014_s29, 7 }
 0x29c   : > { %s2317_s15 = scalar_lea.hbm %s2403_s25, %s1480_s17 }
 0x29f   : > { %599 = vrot.lane.b32.xlu0 %v2196_v25, %s1915_s20  ;;  %595 = vrot.lane.b32.xlu1 %v2196_v25, %s1916_s30 }
 0x30d   : > { %v602_v27 = vpop.permute.xlu1 %601  ;;  %v2219_v37 = vpop.permute.xlu0 %597 }
 0x30e   : > { %604 = vxpose.xlu1.c.b16.start.end [1/1] (short) (narrow) %v602_v27, 32 }
 0x311   : > { %v2202_v28 = vpop.permute.xlu1 %595  ;;  %v2226_v38 = vpop.permute.xlu0 %599 }
 0x374   : > { %v612_v29 = vpop.trf.xlu1 }
 0x375   : > { %v621_v30 = vrot.slane %v612_v29, 4  ;;  %v630_v31 = vsel %vm628_vm2, %v612_v29, 0 }
 0x376   : > { %1522 = vmatpush3.bf16.msra.mxu1 %v630_v31 }
 0x377   : > { %1527 = vmatprep.subr.bf16.mxu1 %v1911_v8  ;;  %v676_v32 = vsel %vm628_vm2, %v621_v30, 0 }
 0x378   : > { %v613_v33 = vpop.trf.xlu1 }
 0x379   : > { %1524 = vmatmul.mubr.msk.bf16.vlgmr.msra.gmra.mrb[0].mxu1 %vm624_vm3, %v2196_v25  ;;  %v722_v34 = vsel %vm628_vm2, %v613_v33, 0  ;;  %v623_v35 = vrot.slane %v613_v33, 4 }
 0x37a   : > { %1528 = vmatpush3.bf16.msra.mxu1 %v676_v32  ;;  %1529 = vmatprep.mubr.msk.bf16.mxu1 %vm1912_vm1, %v1911_v8 }
 0x37b   : > { %1533 = vmatprep.subr.bf16.mxu1 %v1911_v8  ;;  %v768_v36 = vsel %vm628_vm2, %v623_v35, 0 }
 0x381   : > { %1530 = vmatmul.mubr.msk.bf16.vlgmr.msra.gmra.mrb[4].mxu1 %vm624_vm3, %v2202_v28 }
 0x382   : > { %1534 = vmatpush3.bf16.msra.mxu1 %v722_v34  ;;  %1535 = vmatprep.mubr.msk.bf16.mxu1 %vm1912_vm1, %v1911_v8 }
 0x383   : > { %1539 = vmatprep.subr.bf16.mxu1 %v1911_v8 }
 0x389   : > { %1536 = vmatmul.mubr.msk.bf16.vlgmr.msra.gmra.mrb[8].mxu1 %vm624_vm3, %v2219_v37 }
 0x38a   : > { %1540 = vmatpush3.bf16.msra.mxu1 %v768_v36  ;;  %1541 = vmatprep.mubr.msk.bf16.mxu1 %vm1912_vm1, %v1911_v8 }
 0x38b   : > { %1551 = vmatprep.subr.bf16.mxu1 %v1911_v8 }
 0x391   : > { %1542 = vmatmul.mubr.msk.bf16.vlgmr.msra.gmra.mrb[12].mxu1 %vm624_vm3, %v2226_v38 }
 0x392   : > { %1553 = vmatprep.mubr.msk.bf16.mxu1 %vm1912_vm1, %v1911_v8 }
 0x44c   : > { %v666_v44 = vpop.f32.mrb[0].mxu1 }
 0x44d   : > { %v667_v45 = vadd.f32 %v666_v44, %v494_v43  ;;  %v1525_v46 = vpop.f32.mrb[1].mxu1 }
 0x44e   : > { %v669_v47 = vpop.f32.mrb[2].mxu1 }
 0x44f   : > { %v1526_v48 = vpop.f32.mrb[3].mxu1  ;;  %v810_v49 = vsel %vm624_vm3, %v667_v45, -inf }
 0x450   : > { %811 = vmax.xlane.f32.xlu0 %v810_v49 }
 0x454   : > { %v712_v50 = vpop.f32.mrb[4].mxu1 }
 0x455   : > { %v713_v51 = vadd.f32 %v712_v50, %v494_v43  ;;  %v1531_v52 = vpop.f32.mrb[5].mxu1 }
 0x456   : > { %v715_v53 = vpop.f32.mrb[6].mxu1 }
 0x457   : > { %v1532_v54 = vpop.f32.mrb[7].mxu1  ;;  %v813_v55 = vsel %vm624_vm3, %v713_v51, -inf }
 0x458   : > { %814 = vmax.xlane.f32.xlu1 %v813_v55  ;;  %v1691_v54 = vld [vmem:[%s2365_s5] sm:$0xff]  }
 0x45c   : > { %v758_v56 = vpop.f32.mrb[8].mxu1 }
 0x45d   : > { %v759_v57 = vadd.f32 %v758_v56, %v494_v43  ;;  %v1537_v58 = vpop.f32.mrb[9].mxu1 }
 0x45e   : > { %v761_v59 = vpop.f32.mrb[10].mxu1  ;;  %v1692_v58 = vld [vmem:[%s2365_s5 + $0x8] sm:$0xff]  }
 0x45f   : > { %v1538_v60 = vpop.f32.mrb[11].mxu1  ;;  %v816_v61 = vsel %vm624_vm3, %v759_v57, -inf }
 0x460   : > { %817 = vmax.xlane.f32.xlu1 %v816_v61 }
 0x464   : > { %v804_v62 = vpop.f32.mrb[12].mxu1 }
 0x465   : > { %v805_v63 = vadd.f32 %v804_v62, %v494_v43  ;;  %v1543_v1 = vpop.f32.mrb[13].mxu1 }
 0x466   : > { %858 = vrot.lane.b32.xlu0 %v2196_v25, %s1918_s23  ;;  %v807_v2 = vpop.f32.mrb[14].mxu1 }
 0x467   : > { %v1544_v3 = vpop.f32.mrb[15].mxu1  ;;  %v819_v4 = vsel %vm624_vm3, %v805_v63, -inf }
 0x468   : > { %820 = vmax.xlane.f32.xlu1 %v819_v4 }
 0x479   : > { %906 = vrot.lane.b32.xlu1 %v2202_v28, %s1918_s23 }
 0x4dd   : > { %v812_v5 = vpop.xlane.xlu0 %811 }
 0x4de   : > { %v822_v6 = vsub.f32 %v667_v45, %v812_v5 }
 0x4e0   : > { %v826_v7 = vmul.f32 1.442695, %v822_v6 }
 0x4e1   : > { %v859_v9 = vpop.permute.xlu0 %858 }
 0x4e2   : > { %1701 = vpow2.f32 %v826_v7  ;;  %v864_v10 = vsel %vm628_vm2, %v859_v9, 0 }
 0x4e3   : > { %1546 = vmatpush3.bf16.msra.mxu0 %v864_v10 }
 0x4e4   : > { %1557 = vmatprep.subr.bf16.mxu0 %v1911_v8 }
 0x4e5   : > { %v815_v11 = vpop.xlane.xlu1 %814 }
 0x4e6   : > { %v823_v12 = vsub.f32 %v713_v51, %v815_v11 }
 0x4e8   : > { %v828_v13 = vmul.f32 1.442695, %v823_v12 }
 0x4ea   : > { %1703 = vpow2.f32 %v828_v13 }
 0x4ec   : > { %v1702_v14 = vpop.eup %1701 }
 0x4ed   : > { %v818_v15 = vpop.xlane.xlu1 %817  ;;  %v834_v16 = vsel %vm624_vm3, %v1702_v14, 0.0 }
 0x4ee   : > { %v824_v17 = vsub.f32 %v759_v57, %v818_v15  ;;  %835 = vadd.xlane.f32.xlu0 %v834_v16  ;;  %v1463_v16 = vld [vmem:[#allocation5] ss:$0 sm:$0xff] }
 0x4f0   : > { %v830_v18 = vmul.f32 1.442695, %v824_v17 }
 0x4f2   : > { %1705 = vpow2.f32 %v830_v18 }
 0x4f4   : > { %v1704_v19 = vpop.eup %1703 }
 0x4f5   : > { %v821_v20 = vpop.xlane.xlu1 %820  ;;  %v837_v21 = vsel %vm624_vm3, %v1704_v19, 0.0 }
 0x4f6   : > { %v825_v22 = vsub.f32 %v805_v63, %v821_v20  ;;  %838 = vadd.xlane.f32.xlu1 %v837_v21 }
 0x4f8   : > { %v832_v23 = vmul.f32 1.442695, %v825_v22 }
 0x4f9   : > { %v907_v24 = vpop.permute.xlu1 %906 }
 0x4fa   : > { %1707 = vpow2.f32 %v832_v23  ;;  %v912_v25 = vsel %vm628_vm2, %v907_v24, 0 }
 0x4fb   : > { %1552 = vmatpush3.bf16.msra.mxu1 %v912_v25 }
 0x4fc   : > { %v1706_v26 = vpop.eup %1705  ;;  %1563 = vmatprep.subr.bf16.mxu1 %v1911_v8 }
 0x4fd   : > { %v840_v27 = vsel %vm624_vm3, %v1706_v26, 0.0 }
 0x4fe   : > { %841 = vadd.xlane.f32.xlu0 %v840_v27 }
 0x504   : > { %v1708_v28 = vpop.eup %1707 }
 0x505   : > { %v843_v29 = vsel %vm624_vm3, %v1708_v28, 0.0 }
 0x506   : > { %844 = vadd.xlane.f32.xlu1 %v843_v29  ;;  %v1693_v29 = vld [vmem:[%s2369_s9] sm:$0xff]  }
 0x514   : > { %1002 = vrot.lane.b32.xlu0 %v2226_v38, %s1918_s23 }
 0x517   : > { %954 = vrot.lane.b32.xlu1 %v2219_v37, %s1918_s23 }
 0x57b   : > { %v836_v30 = vpop.xlane.xlu0 %835 }
 0x57c   : > { %1709 = vrcp.f32 %v836_v30  ;;  %v1695_v30 = vld [vmem:[%s2371_s11] sm:$0xff]  }
 0x583   : > { %v839_v31 = vpop.xlane.xlu1 %838 }
 0x584   : > { %1711 = vrcp.f32 %v839_v31  ;;  %v1696_v31 = vld [vmem:[%s2371_s11 + $0x8] sm:$0xff]  }
 0x586   : > { %v1710_v32 = vpop.eup %1709 }
 0x587   : > { %v850_v33 = vmul.f32 %v1710_v32, %v1702_v14 }
 0x589   : > { %v854_v34 = vpack.c.bf16 %v850_v33, %v850_v33 }
 0x58b   : > { %1548 = vmatmul.mubr.msk.bf16.vlgmr.msra.gmra.mrb[4].mxu0 %vm624_vm3, %v854_v34  ;;  %v842_v35 = vpop.xlane.xlu0 %841 }
 0x58c   : > { %1713 = vrcp.f32 %v842_v35  ;;  %1559 = vmatprep.mubr.msk.bf16.mxu0 %vm1912_vm1, %v1911_v8 }
 0x58e   : > { %v1712_v36 = vpop.eup %1711 }
 0x58f   : > { %v851_v39 = vmul.f32 %v1712_v36, %v1704_v19  ;;  %v1003_v38 = vpop.permute.xlu0 %1002  ;;  %v1467_v36 = vld [vmem:[#allocation7] ss:$0 sm:$0xff] }
 0x590   : > { %v1008_v37 = vsel %vm628_vm2, %v1003_v38, 0  ;;  %v1468_v38 = vld [vmem:[#allocation8] ss:$0 sm:$0xff] }
 0x591   : > { %v855_v40 = vpack.c.bf16 %v851_v39, %v851_v39 }
 0x593   : > { %1554 = vmatmul.mubr.msk.bf16.vlgmr.msra.gmra.mrb[16].mxu1 %vm624_vm3, %v855_v40  ;;  %v845_v41 = vpop.xlane.xlu1 %844 }
 0x594   : > { %1564 = vmatpush3.bf16.msra.mxu1 %v1008_v37  ;;  %1715 = vrcp.f32 %v845_v41  ;;  %1565 = vmatprep.mubr.msk.bf16.mxu1 %vm1912_vm1, %v1911_v8 }
 0x595   : > { %1577 = vmatprep.subr.bf16.mxu1 %v1911_v8 }
 0x596   : > { %v1714_v42 = vpop.eup %1713 }
 0x597   : > { %v852_v43 = vmul.f32 %v1714_v42, %v1706_v26  ;;  %v955_v44 = vpop.permute.xlu1 %954  ;;  %v1697_v42 = vld [vmem:[%s2371_s11 + $0x10] sm:$0xff]  }
 0x598   : > { %v960_v45 = vsel %vm628_vm2, %v955_v44, 0  ;;  %v1469_v44 = vld [vmem:[%s2370_s10] ss:$0 sm:$0xff] }
 0x599   : > { %1558 = vmatpush3.bf16.msra.mxu0 %v960_v45  ;;  %v856_v46 = vpack.c.bf16 %v852_v43, %v852_v43  ;;  %v1698_v43 = vld [vmem:[%s2371_s11 + $0x18] sm:$0xff]  }
 0x59a   : > { %1569 = vmatprep.subr.bf16.mxu0 %v1911_v8 }
 0x59c   : > { %1560 = vmatmul.mubr.msk.bf16.vlgmr.msra.gmra.mrb[8].mxu0 %vm624_vm3, %v856_v46 }
 0x59d   : > { %1573 = vmatprep.mubr.msk.bf16.mxu0 %vm1912_vm1, %v1911_v8  ;;  %1570 = vmatpush3.bf16.msra.mxu0 %v1691_v54 }
 0x59e   : > { %v1716_v47 = vpop.eup %1715  ;;  %1571 = vmatprep.subr.bf16.mxu0 %v1911_v8 }
 0x59f   : > { %v853_v48 = vmul.f32 %v1716_v47, %v1708_v28 }
 0x5a1   : > { %v857_v49 = vpack.c.bf16 %v853_v48, %v853_v48  ;;  %1572 = vmatpush3.bf16.msra.mxu0 %v1692_v58 }
 0x5a2   : > { %1585 = vmatprep.subr.bf16.mxu0 %v1911_v8 }
 0x5a3   : > { %1566 = vmatmul.mubr.msk.bf16.vlgmr.msra.gmra.mrb[20].mxu1 %vm624_vm3, %v857_v49 }
 0x5a4   : > { %1581 = vmatprep.mubr.msk.bf16.mxu1 %vm1912_vm1, %v1911_v8  ;;  %1578 = vmatpush3.bf16.msra.mxu1 %v1693_v29 }
 0x5a5   : > { %1579 = vmatprep.subr.bf16.mxu1 %v1911_v8 }
 0x65e   : > { %v900_v50 = vpop.f32.mrb[4].mxu0 }
 0x65f   : > { %v1549_v51 = vpop.f32.mrb[5].mxu0  ;;  %v1050_v10 = vpack.c.bf16 %v900_v50, %v900_v50 }
 0x660   : > { %v903_v52 = vpop.f32.mrb[6].mxu0 }
 0x661   : > { %v1550_v53 = vpop.f32.mrb[7].mxu0 }
 0x666   : > { %v948_v55 = vpop.f32.mrb[16].mxu1 }
 0x667   : > { %v1051_v56 = vpack.c.bf16 %v948_v55, %v948_v55  ;;  %v1555_v57 = vpop.f32.mrb[17].mxu1 }
 0x668   : > { %v951_v59 = vpop.f32.mrb[18].mxu1 }
 0x669   : > { %1055 = vrot.lane.b32.xlu1 %v1051_v56, %s1919_s14  ;;  %v1556_v60 = vpop.f32.mrb[19].mxu1  ;;  %s1922_s14 = smov [#allocation10]  }
 0x66f   : > { %v996_v61 = vpop.f32.mrb[8].mxu0 }
 0x670   : > { %v1052_v62 = vpack.c.bf16 %v996_v61, %v996_v61  ;;  %v1561_v63 = vpop.f32.mrb[9].mxu0 }
 0x671   : > { %v999_v1 = vpop.f32.mrb[10].mxu0 }
 0x672   : > { %1058 = vrot.lane.b32.xlu0 %v1052_v62, %s1920_s22  ;;  %v1562_v2 = vpop.f32.mrb[11].mxu0  ;;  %s1835_s22 = sshll.u32 %s1922_s14, 4  ;;  %s1836_s22 = int_to_ptr.vmem [resolvable:$false] %s1835_s22 }
 0x676   : > { %v1044_v3 = vpop.f32.mrb[20].mxu1 }
 0x677   : > { %v1053_v4 = vpack.c.bf16 %v1044_v3, %v1044_v3  ;;  %v1567_v5 = vpop.f32.mrb[21].mxu1 }
 0x678   : > { %v1047_v6 = vpop.f32.mrb[22].mxu1 }
 0x679   : > { %1061 = vrot.lane.b32.xlu1 %v1053_v4, %s1921_s24  ;;  %v1568_v7 = vpop.f32.mrb[23].mxu1  ;;  %s480_s24 = sand.u32 1, %s1897_s26  }
 0x67a   : > { %s1447_s13 = sshll.u32 %s480_s24, 3  ;;  %s1322_s29 = scalar_lea.sflag [#allocation4], %s480_s24 }
 0x67b   : > { %s482_s19 = scalar_lea.vmem [#allocation10], %s1447_s13  ;;  %s1837_s13 = scalar_lea.vmem %s1836_s22, 256 }
 0x67c   : > { %s1335_s20 = sshll.u32 %s482_s19, 4  ;;  %s2319_s20 = int_to_ptr.vmem [resolvable:$true] %s1335_s20 }
 0x67d   : > { %s1831_s27 = scalar_lea.vmem %s2319_s20, 128  ;;  %p1838_p8 = scmp.lt.s32.totalorder %s2319_s20, %s1836_s22 }
 0x67e   : > { %p1832_p2 = scmp.ne.s32.totalorder %s2319_s20, %s1831_s27  ;;  %p1839_p11 = scmp.lt.s32.totalorder %s1837_s13, %s1831_s27 }
 0x680   : > { %p1833_p4 = pnand %p1832_p2, %p2405_p3  ;;  %p1840_p13 = por %p1839_p11, %p1838_p8 }
 0x682   : > { %p1834_p7 = pneg %p1833_p4 }
 0x684   : > { %p1841_p1 = pnand %p1840_p13, %p1834_p7 }
 0x6db   : > { %v1056_v9 = vpop.permute.xlu1 %1055 }
 0x6dc   : > { %v1065_v12 = vsel %vm624_vm3, %v1050_v10, %v1056_v9 }
 0x6e4   : > { %v1059_v11 = vpop.permute.xlu0 %1058 }
 0x6e5   : > { %v1068_v13 = vsel %vm1066_vm5, %v1065_v12, %v1059_v11 }
 0x6eb   : > { %v1062_v14 = vpop.permute.xlu1 %1061 }
 0x6ec   : > { %v1071_v15 = vsel %vm1069_vm6, %v1068_v13, %v1062_v14 }
 0x6ed   : > { %1574 = vmatmul.mubr.msk.bf16.vlgmr.msra.gmra.mrb[12].mxu0 %vm497_vm0, %v1071_v15 }
 0x6ee   : > { %1593 = vmatprep.mubr.msk.bf16.mxu0 %vm1912_vm1, %v1911_v8  ;;  %1586 = vmatpush3.bf16.msra.mxu0 %v1695_v30 }
 0x6ef   : > { %1587 = vmatprep.subr.bf16.mxu0 %v1911_v8 }
 0x6f2   : > { %1588 = vmatpush3.bf16.msra.mxu0 %v1696_v31 }
 0x6f3   : > { %1589 = vmatprep.subr.bf16.mxu0 %v1911_v8 }
 0x6f6   : > { %1590 = vmatpush3.bf16.msra.mxu0 %v1697_v42 }
 0x6f7   : > { %1591 = vmatprep.subr.bf16.mxu0 %v1911_v8  ;;  %v1473_v8 = vld [vmem:[%s2372_s12] ss:$0 sm:$0xff] }
 0x6fa   : > { %1592 = vmatpush3.bf16.msra.mxu0 %v1698_v43 }
 0x7c0   : > { %v1131_v17 = vpop.f32.mrb[12].mxu0 }
 0x7c1   : > { %v1132_v18 = vadd.f32 %v1463_v16, %v1131_v17  ;;  %v1575_v19 = vpop.f32.mrb[13].mxu0 }
 0x7c2   : > { %v1134_v20 = vpop.f32.mrb[14].mxu0 }
 0x7c3   : > { %v1137_v21 = vadd.f32 %v1132_v18, %v2167_v0  ;;  %v1576_v22 = vpop.f32.mrb[15].mxu0  ;;  %v1694_v0 = vld [vmem:[%s2369_s9 + $0x8] sm:$0xff]  }
 0x7c4   : > { %1580 = vmatpush3.bf16.msra.mxu1 %v1694_v0 }
 0x7c5   : > { %v1140_v23 = vsel %vm497_vm0, %v1137_v21, 0.0 }
 0x7c6   : > { %1141 = vadd.xlane.f32.xlu0 %v1140_v23 }
 0x853   : > { %v1142_v24 = vpop.xlane.xlu0 %1141 }
 0x854   : > { %v1143_v25 = vmul.f32 0.03125, %v1142_v24 }
 0x856   : > { %v1144_v26 = vsub.f32 %v1137_v21, %v1143_v25 }
 0x858   : > { %v1145_v27 = vmul.f32 %v1144_v26, %v1144_v26 }
 0x85a   : > { %v1146_v28 = vsel %vm497_vm0, %v1145_v27, 0.0 }
 0x85b   : > { %1147 = vadd.xlane.f32.xlu1 %v1146_v28 }
 0x8e8   : > { %v1148_v32 = vpop.xlane.xlu1 %1147 }
 0x8e9   : > { %v1149_v33 = vmul.f32 0.03125, %v1148_v32 }
 0x8eb   : > { %v1150_v34 = vadd.f32 1e-05, %v1149_v33 }
 0x8ed   : > { %1717 = vrsqrt.f32 %v1150_v34 }
 0x8f7   : > { %v1718_v35 = vpop.eup %1717 }
 0x8f8   : > { %v1152_v39 = vmul.f32 %v1718_v35, %v1144_v26 }
 0x8fa   : > { %v1159_v40 = vmul.f32 %v1467_v36, %v1152_v39 }
 0x8fc   : > { %v1166_v37 = vadd.f32 %v1468_v38, %v1159_v40 }
 0x8fe   : > { %v1167_v41 = vpack.c.bf16 %v1166_v37, %v1166_v37 }
 0x900   : > { %1582 = vmatmul.mubr.msk.bf16.vlgmr.msra.gmra.mrb[24].mxu1 %vm497_vm0, %v1167_v41 }
 0x9d3   : > { %v1228_v45 = vpop.f32.mrb[24].mxu1 }
 0x9d4   : > { %v1229_v46 = vadd.f32 %v1469_v44, %v1228_v45  ;;  %v1583_v47 = vpop.f32.mrb[25].mxu1 }
 0x9d5   : > { %v1231_v48 = vpop.f32.mrb[26].mxu1 }
 0x9d6   : > { %v1234_v49 = vmax.f32 %v1229_v46, 0.0  ;;  %v1584_v50 = vpop.f32.mrb[27].mxu1 }
 0x9d8   : > { %v1235_v51 = vpack.c.bf16 %v1234_v49, %v1234_v49 }
 0x9da   : > { %1594 = vmatmul.mubr.msk.bf16.vlgmr.msra.gmra.mrb[16].mxu0 %vm1275_vm7, %v1235_v51 }
 0xaad   : > { %v1313_v52 = vpop.f32.mrb[16].mxu0 }
 0xaae   : > { %v1314_v53 = vadd.f32 %v1473_v8, %v1313_v52  ;;  %v1595_v54 = vpop.f32.mrb[17].mxu0 }
 0xaaf   : > { %v1316_v55 = vpop.f32.mrb[18].mxu0 }
 0xab0   : > { %v1319_v56 = vadd.f32 %v1314_v53, %v1137_v21  ;;  %v1596_v57 = vpop.f32.mrb[19].mxu0 }
 0xab2   : > { %1320 = vst.msk [vmem:[%s482_s19] sm:$0xff] %vm497_vm0, %v1319_v56 }
 0xab3   : > { %1844 = shalt.err (!%p1841_p1)
}
 0xab4   : > { %s1845_s24 = scalar_lea.hbm %s2317_s15, 128  ;;  %s1849_s17 = scalar_lea.hbm %s2404_s21, 256 }
 0xab5   : > { %p1846_p0 = scmp.ne.s32.totalorder %s2317_s15, %s1845_s24  ;;  %p1850_p9 = scmp.lt.u32.totalorder %s2317_s15, %s2404_s21 }
 0xab6   : > { %p1851_p12 = scmp.lt.u32.totalorder %s1849_s17, %s1845_s24  ;;  %p1853_p2 = scmp.lt.u32.totalorder %s1845_s24, %s2317_s15 }
 0xab7   : > { %p1847_p6 = pnand %p1846_p0, %p2405_p3 }
 0xab8   : > { %p1852_p10 = por %p1851_p12, %p1850_p9 }
 0xab9   : > { %p1848_p5 = pneg %p1847_p6 }
 0xaba   : > { %p1854_p4 = por %p1853_p2, %p1852_p10 }
 0xabc   : > { %p1855_p7 = pnand %p1854_p4, %p1848_p5 }
 0xabe   : > { %1858 = shalt.err (!%p1855_p7)
}
 0xabf   : > { %1613 = dma.vmem_to_hbm [thread:$0]  (%p2405_p3), %s2319_s20, 128, %s2317_s15, %s1322_s29  }
 0xac0 PF: > { %s2406_s23 = sld [smem:[#allocation17_spill]]  ;;  %s2407_s25 = sld [smem:[#allocation15_spill]] }
 0xac1   : > { %s2408_s27 = sld [smem:[#allocation20_spill]] }
 0xac6   : > { %p1640_p8 = scmp.ge.s32.totalorder %s2406_s23, 2  ;;  %s1347_s14 = sand.u32 1, %s2407_s25  }
 0xac7   : > { %p2409_p11 = scmp.ne.s32.totalorder %s2408_s27, 0  ;;  %s1348_s22 = scalar_lea.sflag [#allocation4], %s1347_s14 }
 0xac9   : > { %p1629_p13 = pnand %p1640_p8, %p2409_p11 }
 0xacb   : > { %1888 = dma.done.wait (!%p1629_p13), %s1348_s22, 128  }
 0xacc   : > { %1890 = vsyncadd (!%p1629_p13), %s1348_s22, 4294967168  ;;  %s2410_s28 = sld [smem:[#allocation18_spill]]  ;;  %s2411_s13 = sld [smem:[#allocation16_spill]] }
 0xacd   : > { %s2412_s27 = sld [smem:[#allocation19_spill]]  ;;  %s2413_s25 = smov %s1897_s26 }
 0xad2   : > { %p26_p1 = scmp.ge.s32.totalorder %s2410_s28, 4   ;;  %s2414_s26 = smov %s2411_s13 }
 0xad4   :  { %28 = sbr.rel (!%p26_p1) target bundleno = 8 (0x8), region = 124 }
 0xadb   :  { %1353 = vsyncpa [#allocation3], 1 }
 0xadc   :  { %1355 = vsyncpa [#allocation3 + $0x1], 1 }
 0xadd   :  { %1356 = vsyncpa [#allocation6], 1 }
 0xade   :  { %1357 = vsyncpa [#allocation9], 1 }
 0xadf   :  { %1358 = vsyncpa [#allocation4], 1 }
 0xae0   :  { %1360 = vsyncpa [#allocation4 + $0x1], 1 }

// kernel: tpu_custom_call.1
= control target key start
LH: loop header
LB: loop body
LE: loop exit
PB: predicated region body
PF: predicated region fallthrough
CT: control target
= control target key end

     0   :  { %s2360_s0 = inlined_call_operand.vmem [shape: f32[2,8,32], index: 0, kind: input, shape index: {}]   ;;  %s2361_s1 = inlined_call_operand.vmem [shape: f32[1,32], index: 1, kind: input, shape index: {}]   ;;  %s2362_s2 = inlined_call_operand.vmem [shape: f32[1,32], index: 2, kind: input, shape index: {}]   ;;  %s2363_s3 = inlined_call_operand.vmem [shape: bf16[32,96], index: 3, kind: input, shape index: {}]   ;;  %s2364_s4 = inlined_call_operand.hbm [shape: f32[1,96], index: 4, kind: input, shape index: {}]   ;;  %s2365_s5 = inlined_call_operand.vmem [shape: bf16[32,32], index: 5, kind: input, shape index: {}]   ;;  %s2366_s6 = inlined_call_operand.hbm [shape: f32[1,32], index: 6, kind: input, shape index: {}]   ;;  %s2367_s7 = inlined_call_operand.hbm [shape: f32[1,32], index: 7, kind: input, shape index: {}]   ;;  %s2368_s8 = inlined_call_operand.hbm [shape: f32[1,32], index: 8, kind: input, shape index: {}]   ;;  %s2369_s9 = inlined_call_operand.vmem [shape: bf16[32,64], index: 9, kind: input, shape index: {}]   ;;  %s2370_s10 = inlined_call_operand.vmem [shape: f32[1,64], index: 10, kind: input, shape index: {}]   ;;  %s2371_s11 = inlined_call_operand.vmem [shape: bf16[64,32], index: 11, kind: input, shape index: {}]   ;;  %s2372_s12 = inlined_call_operand.vmem [shape: f32[1,32], index: 12, kind: input, shape index: {}]   ;;  %s2373_s13 = inlined_call_operand.hbm [shape: f32[2,8,32], index: 13, kind: output, shape index: {}]  }
   0x1   :  { %2384 = sst [smem:[#allocation21_spill]] %s2373_s13 }
   0x2   :  { %18 = vsyncpa [#allocation3], 0 }
   0x3   :  { %19 = vsyncpa [#allocation6], 0 }
   0x4   :  { %20 = vsyncpa [#allocation9], 0 }
   0x5   :  { %21 = vsyncpa [#allocation4], 0 }
   0x6   :  { %23 = vsyncpa [#allocation4 + $0x1], 0  ;;  %s1993_s25 = smov 0   ;;  %s1995_s26 = smov 0  }
   0x7   :  { %s1997_s27 = smov 0   ;;  %s1999_s28 = smov 0  }
   0x8 LB: > { %2385 = sst [smem:[#allocation15_spill]] %s1893_s25  ;;  %s2014_s29 = sadd.s32 4294967295, %s1905_s28   ;;  %s1905_s28 = sphi %s1999_s28, %s2410_s28   ;;  %s1901_s27 = sphi %s1997_s27, %s2412_s27   ;;  %s1897_s26 = sphi %s1995_s26, %s2414_s26   ;;  %s1893_s25 = sphi %s1993_s25, %s2413_s25  }
   0x9   : > { %2386 = sst [smem:[#allocation16_spill]] %s1901_s27  ;;  %s1435_s30 = sadd.s32 4294967294, %s1905_s28  }
   0xa   : > { %2387 = sst [smem:[#allocation17_spill]] %s1905_s28  ;;  %s2018_s14 = sadd.s32 1, %s1905_s28  }
   0xb   : > { %2388 = sst [smem:[#allocation18_spill]] %s2018_s14  ;;  %s314_s15 = sadd.s32 1, %s1901_s27 }
   0xc   : > { %s311_s16 = ssub.s32 %s1905_s28, %s2018_s14  ;;  %p324_p0 = scmp.ne.s32.totalorder %s1901_s27, %s1897_s26 }
   0xd   : > { %p312_p1 = scmp.eq.s32.totalorder %s311_s16, 0  ;;  %p325_p2 = scmp.eq.s32.totalorder %s2014_s29, 1 }
   0xe   : > { %p330_p3 = scmp.ne.s32.totalorder %s1897_s26, %s1893_s25  ;;  %p331_p4 = scmp.eq.s32.totalorder %s1435_s30, 1 }
   0xf   : > { %s2029_s17 = scalar_select %p312_p1, %s1901_s27, %s314_s15  }
  0x10   : > { %p2031_p5 = por %p325_p2, %p324_p0  ;;  %p2035_p6 = por %p331_p4, %p330_p3 }
  0x11   : > { %2389 = sst [smem:[#allocation19_spill]] %s2029_s17  ;;  %p1436_p7 = scmp.ge.s32.totalorder %s1905_s28, 1 }
  0x12   : > { %s2390_s18 = scalar_select %p2031_p5, 1, 0 }
  0x13   : > { %s2391_s19 = scalar_select %p2035_p6, 1, 0 }
  0x14   : > { %p338_p8 = scmp.lt.s32.totalorder %s1905_s28, 3  ;;  %p2379_p9 = scmp.eq.s32.totalorder %s2014_s29, 0 }
  0x15   : > { %2392 = sst [smem:[#allocation20_spill]] %s2391_s19  ;;  %s1907_s21 = smov [#allocation5]  }
  0x16   : > { %p2042_p10 = pnand %p1436_p7, %p338_p8  ;;  %s374_s22 = sshll.u32 %s1907_s21, 4  ;;  %s375_s22 = int_to_ptr.vmem [resolvable:$true] %s374_s22 }
  0x17   : > { %s1908_s23 = smov [#allocation2]   ;;  %s1909_s15 = smov [#allocation7]  }
  0x18   : > { %s2393_s20 = scalar_select %p2042_p10, 1, 0 }
  0x19   : > { %p1615_p11 = pneg %p2042_p10  ;;  %s360_s24 = sshll.u32 %s1908_s23, 4  ;;  %s2054_s24 = int_to_ptr.vmem [resolvable:$true] %s360_s24 }
  0x1a   : > { %s385_s16 = sshll.u32 %s1909_s15, 4  ;;  %s1719_s21 = scalar_lea.hbm %s2366_s6, 16  ;;  %s2056_s16 = int_to_ptr.vmem [resolvable:$true] %s385_s16 }
  0x1b   : > { %p2050_p12 = pnand %p2379_p9, %p1615_p11  ;;  %p1720_p13 = scmp.ne.s32.totalorder %s2366_s6, %s1719_s21 }
  0x1c   : > { %p1726_p3 = scmp.lt.u32.totalorder %s1719_s21, %s2366_s6 }
  0x1d   : > { %p2066_p0 = pneg %p2050_p12 }
  0x1f   : > { %p1722_p1 = pnand %p2066_p0, %p1720_p13 }
  0x21   : > { %p1723_p2 = pneg %p1722_p1 }
  0x23   : > { %p1728_p4 = pnand %p1726_p3, %p1723_p2 }
  0x25   : > { %1731 = shalt.err (!%p1728_p4)
}
  0x26   : > { %s1732_s27 = scalar_lea.vmem %s375_s22, 16  ;;  %s1739_s14 = scalar_lea.vmem %s375_s22, 32 }
  0x27   : > { %p1733_p7 = scmp.ne.s32.totalorder %s375_s22, %s1732_s27  ;;  %p1740_p9 = scmp.lt.s32.totalorder %s375_s22, %s375_s22 }
  0x28   : > { %p1741_p6 = scmp.lt.s32.totalorder %s1739_s14, %s1732_s27 }
  0x29   : > { %p1735_p8 = pnand %p1733_p7, %p2066_p0 }
  0x2a   : > { %p1742_p5 = por %p1741_p6, %p1740_p9 }
  0x2b   : > { %p1736_p11 = pneg %p1735_p8 }
  0x2d   : > { %p1743_p10 = pnand %p1742_p5, %p1736_p11 }
  0x2f   : > { %1746 = shalt.err (!%p1743_p10)
}
  0x30   : > { %1621 = dma.hbm_to_vmem [thread:$0]  (!%p2050_p12), %s2366_s6, 16, %s375_s22, [#allocation6]  }
  0x31   : > { %s1747_s15 = scalar_lea.hbm %s2364_s4, 16 }
  0x32   : > { %p1748_p13 = scmp.ne.s32.totalorder %s2364_s4, %s1747_s15  ;;  %p1754_p5 = scmp.lt.u32.totalorder %s1747_s15, %s2364_s4 }
  0x34   : > { %p1750_p1 = pnand %p1748_p13, %p2066_p0 }
  0x36   : > { %p1751_p6 = pneg %p1750_p1 }
  0x38   : > { %p1756_p9 = pnand %p1754_p5, %p1751_p6 }
  0x3a   : > { %1759 = shalt.err (!%p1756_p9)
}
  0x3b   : > { %s1760_s22 = scalar_lea.vmem %s2054_s24, 16  ;;  %s1767_s13 = scalar_lea.vmem %s2054_s24, 32 }
  0x3c   : > { %p1761_p10 = scmp.ne.s32.totalorder %s2054_s24, %s1760_s22  ;;  %p1768_p4 = scmp.lt.s32.totalorder %s2054_s24, %s2054_s24 }
  0x3d   : > { %p1769_p7 = scmp.lt.s32.totalorder %s1767_s13, %s1760_s22 }
  0x3e   : > { %p1763_p2 = pnand %p1761_p10, %p2066_p0 }
  0x3f   : > { %p1770_p8 = por %p1769_p7, %p1768_p4 }
  0x40   : > { %p1764_p3 = pneg %p1763_p2 }
  0x42   : > { %p1771_p11 = pnand %p1770_p8, %p1764_p3 }
  0x44   : > { %1774 = shalt.err (!%p1771_p11)
}
  0x45   : > { %1618 = dma.hbm_to_vmem [thread:$0]  (!%p2050_p12), %s2364_s4, 16, %s2054_s24, [#allocation3]  }
  0x46   : > { %s1775_s21 = scalar_lea.hbm %s2367_s7, 16 }
  0x47   : > { %p1776_p13 = scmp.ne.s32.totalorder %s2367_s7, %s1775_s21  ;;  %p1782_p5 = scmp.lt.u32.totalorder %s1775_s21, %s2367_s7 }
  0x49   : > { %p1778_p1 = pnand %p1776_p13, %p2066_p0 }
  0x4b   : > { %p1779_p6 = pneg %p1778_p1 }
  0x4d   : > { %p1784_p9 = pnand %p1782_p5, %p1779_p6 }
  0x4f   : > { %1787 = shalt.err (!%p1784_p9)
}
  0x50   : > { %s1788_s24 = scalar_lea.vmem %s2056_s16, 16  ;;  %s1795_s13 = scalar_lea.vmem %s2056_s16, 32 }
  0x51   : > { %p1789_p10 = scmp.ne.s32.totalorder %s2056_s16, %s1788_s24  ;;  %p1796_p4 = scmp.lt.s32.totalorder %s2056_s16, %s2056_s16 }
  0x52   : > { %p1797_p7 = scmp.lt.s32.totalorder %s1795_s13, %s1788_s24 }
  0x53   : > { %p1791_p2 = pnand %p1789_p10, %p2066_p0 }
  0x54   : > { %p1798_p8 = por %p1797_p7, %p1796_p4 }
  0x55   : > { %p1792_p3 = pneg %p1791_p2 }
  0x57   : > { %p1799_p11 = pnand %p1798_p8, %p1792_p3 }
  0x59   : > { %1802 = shalt.err (!%p1799_p11)
}
  0x5a   : > { %1624 = dma.hbm_to_vmem [thread:$0]  (!%p2050_p12), %s2367_s7, 16, %s2056_s16, [#allocation6]  }
  0x5b   : > { %s1910_s19 = smov [#allocation8]   ;;  %s1803_s27 = scalar_lea.hbm %s2368_s8, 16 }
  0x5c   : > { %s396_s25 = sshll.u32 %s1910_s19, 4  ;;  %p1804_p13 = scmp.ne.s32.totalorder %s2368_s8, %s1803_s27  ;;  %s397_s25 = int_to_ptr.vmem [resolvable:$true] %s396_s25 }
  0x5d   : > { %p1810_p5 = scmp.lt.u32.totalorder %s1803_s27, %s2368_s8 }
  0x5e   : > { %p1806_p1 = pnand %p1804_p13, %p2066_p0 }
  0x60   : > { %p1807_p6 = pneg %p1806_p1 }
  0x62   : > { %p1812_p9 = pnand %p1810_p5, %p1807_p6 }
  0x64   : > { %1815 = shalt.err (!%p1812_p9)
}
  0x65   : > { %s1816_s16 = scalar_lea.vmem %s397_s25, 16  ;;  %s1823_s28 = scalar_lea.vmem %s397_s25, 32 }
  0x66   : > { %p1817_p10 = scmp.ne.s32.totalorder %s397_s25, %s1816_s16  ;;  %p1824_p4 = scmp.lt.s32.totalorder %s397_s25, %s397_s25 }
  0x67   : > { %p1825_p7 = scmp.lt.s32.totalorder %s1823_s28, %s1816_s16 }
  0x68   : > { %p1819_p2 = pnand %p1817_p10, %p2066_p0 }
  0x69   : > { %p1826_p8 = por %p1825_p7, %p1824_p4 }
  0x6a   : > { %p1820_p3 = pneg %p1819_p2 }
  0x6c   : > { %p1827_p11 = pnand %p1826_p8, %p1820_p3 }
  0x6e   : > { %1830 = shalt.err (!%p1827_p11)
}
  0x6f   : > { %1627 = dma.hbm_to_vmem [thread:$0]  (!%p2050_p12), %s2368_s8, 16, %s397_s25, [#allocation9]  }
  0x70   : > { %p2396_p13 = scmp.ne.s32.totalorder %s2393_s20, 0 }
  0x71   : > { %p2397_p1 = scmp.eq.s32.totalorder (!%p2396_p13), %s2014_s29, 0 }
  0x72   : > { %428 = sbr.rel (%p2396_p13) target bundleno = 2752 (0xac0), region = 72 }
  0x79   : > { %1876 = dma.done.wait (%p2397_p1), [#allocation3], 16   ;;  %p2398_p0 = pmov %p2397_p1 }
  0x7b   : > { %1878 = vsyncadd (%p2398_p0), [#allocation3], 4294967280  ;;  %p2399_p6 = pmov %p2398_p0 }
  0x7c   : > { %p2400_p5 = pmov %p2398_p0 }
  0x7d   : > { %1880 = dma.done.wait (%p2399_p6), [#allocation6], 32  }
  0x7e   : > { %1882 = vsyncadd (%p2400_p5), [#allocation6], 4294967264  ;;  %p2401_p9 = pmov %p2398_p0 }
  0x7f   : > { %p2402_p12 = pmov %p2398_p0 }
  0x80   : > { %1884 = dma.done.wait (%p2401_p9), [#allocation9], 16  }
  0x81   : > { %1886 = vsyncadd (%p2402_p12), [#allocation9], 4294967280  ;;  %p483_p10 = scmp.lt.s32.totalorder %s2014_s29, 1  ;;  %vm497_vm0 = vcmask 261120   ;;  %v1689_v7 = vld [vmem:[%s2363_s3] sm:$0xff]   ;;  %v1911_v8 = vmov 0.0   ;;  %v489_v39 = vlaneseq }
  0x82   : > { %1513 = vmatprep.subr.bf16.mxu0 %v1911_v8  ;;  %vm1912_vm1 = vmmov 0   ;;  %v1690_v9 = vld [vmem:[%s2363_s3 + $0x8] sm:$0xff]   ;;  %1521 = vmatprep.subr.bf16.mxu1 %v1911_v8  ;;  %v1449_v14 = vld [vmem:[%s2361_s1] ss:$0 sm:$0xff]  ;;  %s1913_s17 = smov 112   ;;  %s1914_s19 = smov 96  }
  0x83   : > { %s484_s20 = scalar_select %p483_p10, %s2014_s29, 1  ;;  %1517 = vmatprep.mubr.msk.bf16.mxu0 %vm1912_vm1, %v1911_v8  ;;  %1514 = vmatpush3.bf16.msra.mxu0 %v1689_v7  ;;  %v1450_v16 = vld [vmem:[%s2362_s2] ss:$0 sm:$0xff]  ;;  %vm628_vm2 = vcmask 1043456   ;;  %vm624_vm3 = vcmask 64512   ;;  %v490_v40 = vshrl.u32 %v489_v39, 7 }
  0x84   : > { %1515 = vmatprep.subr.bf16.mxu0 %v1911_v8  ;;  %1523 = vmatprep.mubr.msk.bf16.mxu1 %vm1912_vm1, %v1911_v8  ;;  %v1451_v20 = vld [vmem:[#allocation2] ss:$0 sm:$0xff]  ;;  %v492_v41 = vand.u32 127, %v489_v39  ;;  %v1917_v42 = vmov -1e+30   ;;  %s1918_s23 = smov 64  }
  0x85   : > { %s1448_s30 = sshll.u32 %s484_s20, 3  ;;  %s1915_s20 = smov 104   ;;  %vm1066_vm5 = vcmask 130048   ;;  %vm1069_vm6 = vcmask 195584   ;;  %vm1275_vm7 = vcmask 523264  }
  0x86   : > { %s486_s21 = scalar_lea.vmem %s2360_s0, %s1448_s30  ;;  %s1916_s30 = smov 120   ;;  %vm493_vm4 = vcmp.le.s32.totalorder %v492_v41, %v490_v40 }
  0x87   : > { %v2167_v0 = vld [vmem:[%s486_s21] sm:$0xff]  ;;  %1516 = vmatpush3.bf16.msra.mxu0 %v1690_v9  ;;  %v494_v43 = vsel %vm493_vm4, 0.0, %v1917_v42  ;;  %s1919_s14 = smov 8   ;;  %s1920_s22 = smov 16  }
  0x88   : > { %v498_v1 = vsel %vm497_vm0, %v2167_v0, 0.0  ;;  %1545 = vmatprep.subr.bf16.mxu0 %v1911_v8  ;;  %s1921_s24 = smov 24   ;;  %s2403_s25 = sld [smem:[#allocation21_spill]] }
  0x89   : > { %499 = vadd.xlane.f32.xlu0 %v498_v1  ;;  %p2405_p3 = scmp.ne.s32.totalorder %s2390_s18, 0 }
  0x8e   : > { %s2404_s21 = smov %s2403_s25 }
 0x116   : > { %v500_v2 = vpop.xlane.xlu0 %499 }
 0x117   : > { %v502_v3 = vmul.f32 0.03125, %v500_v2 }
 0x119   : > { %v503_v4 = vsub.f32 %v2167_v0, %v502_v3 }
 0x11b   : > { %v504_v5 = vmul.f32 %v503_v4, %v503_v4 }
 0x11d   : > { %v505_v6 = vsel %vm497_vm0, %v504_v5, 0.0 }
 0x11e   : > { %506 = vadd.xlane.f32.xlu0 %v505_v6 }
 0x1ab   : > { %v507_v10 = vpop.xlane.xlu0 %506 }
 0x1ac   : > { %v508_v11 = vmul.f32 0.03125, %v507_v10 }
 0x1ae   : > { %v509_v12 = vadd.f32 1e-05, %v508_v11 }
 0x1b0   : > { %1699 = vrsqrt.f32 %v509_v12 }
 0x1ba   : > { %v1700_v13 = vpop.eup %1699 }
 0x1bb   : > { %v511_v15 = vmul.f32 %v1700_v13, %v503_v4 }
 0x1bd   : > { %v518_v17 = vmul.f32 %v1449_v14, %v511_v15 }
 0x1bf   : > { %v525_v18 = vadd.f32 %v1450_v16, %v518_v17 }
 0x1c1   : > { %v526_v19 = vpack.c.bf16 %v525_v18, %v525_v18 }
 0x1c3   : > { %1518 = vmatmul.mubr.msk.bf16.vlgmr.msra.gmra.mrb[0].mxu0 %vm497_vm0, %v526_v19 }
 0x1c4   : > { %1547 = vmatprep.mubr.msk.bf16.mxu0 %vm1912_vm1, %v1911_v8 }
 0x296   : > { %v587_v21 = vpop.f32.mrb[0].mxu0 }
 0x297   : > { %v588_v22 = vadd.f32 %v1451_v20, %v587_v21  ;;  %v1519_v23 = vpop.f32.mrb[1].mxu0 }
 0x298   : > { %v590_v24 = vpop.f32.mrb[2].mxu0 }
 0x299   : > { %v2196_v25 = vpack.c.bf16 %v588_v22, %v588_v22  ;;  %v1520_v26 = vpop.f32.mrb[3].mxu0 }
 0x29b   : > { %597 = vrot.lane.b32.xlu0 %v2196_v25, %s1913_s17  ;;  %601 = vrot.lane.b32.xlu1 %v2196_v25, %s1914_s19  ;;  %s1480_s17 = sshll.u32 %s2014_s29, 7 }
 0x29c   : > { %s2317_s15 = scalar_lea.hbm %s2403_s25, %s1480_s17 }
 0x29f   : > { %599 = vrot.lane.b32.xlu0 %v2196_v25, %s1915_s20  ;;  %595 = vrot.lane.b32.xlu1 %v2196_v25, %s1916_s30 }
 0x30d   : > { %v602_v27 = vpop.permute.xlu1 %601  ;;  %v2219_v37 = vpop.permute.xlu0 %597 }
 0x30e   : > { %604 = vxpose.xlu1.c.b16.start.end [1/1] (short) (narrow) %v602_v27, 32 }
 0x311   : > { %v2202_v28 = vpop.permute.xlu1 %595  ;;  %v2226_v38 = vpop.permute.xlu0 %599 }
 0x374   : > { %v612_v29 = vpop.trf.xlu1 }
 0x375   : > { %v621_v30 = vrot.slane %v612_v29, 4  ;;  %v630_v31 = vsel %vm628_vm2, %v612_v29, 0 }
 0x376   : > { %1522 = vmatpush3.bf16.msra.mxu1 %v630_v31 }
 0x377   : > { %1527 = vmatprep.subr.bf16.mxu1 %v1911_v8  ;;  %v676_v32 = vsel %vm628_vm2, %v621_v30, 0 }
 0x378   : > { %v613_v33 = vpop.trf.xlu1 }
 0x379   : > { %1524 = vmatmul.mubr.msk.bf16.vlgmr.msra.gmra.mrb[0].mxu1 %vm624_vm3, %v2196_v25  ;;  %v722_v34 = vsel %vm628_vm2, %v613_v33, 0  ;;  %v623_v35 = vrot.slane %v613_v33, 4 }
 0x37a   : > { %1528 = vmatpush3.bf16.msra.mxu1 %v676_v32  ;;  %1529 = vmatprep.mubr.msk.bf16.mxu1 %vm1912_vm1, %v1911_v8 }
 0x37b   : > { %1533 = vmatprep.subr.bf16.mxu1 %v1911_v8  ;;  %v768_v36 = vsel %vm628_vm2, %v623_v35, 0 }
 0x381   : > { %1530 = vmatmul.mubr.msk.bf16.vlgmr.msra.gmra.mrb[4].mxu1 %vm624_vm3, %v2202_v28 }
 0x382   : > { %1534 = vmatpush3.bf16.msra.mxu1 %v722_v34  ;;  %1535 = vmatprep.mubr.msk.bf16.mxu1 %vm1912_vm1, %v1911_v8 }
 0x383   : > { %1539 = vmatprep.subr.bf16.mxu1 %v1911_v8 }
 0x389   : > { %1536 = vmatmul.mubr.msk.bf16.vlgmr.msra.gmra.mrb[8].mxu1 %vm624_vm3, %v2219_v37 }
 0x38a   : > { %1540 = vmatpush3.bf16.msra.mxu1 %v768_v36  ;;  %1541 = vmatprep.mubr.msk.bf16.mxu1 %vm1912_vm1, %v1911_v8 }
 0x38b   : > { %1551 = vmatprep.subr.bf16.mxu1 %v1911_v8 }
 0x391   : > { %1542 = vmatmul.mubr.msk.bf16.vlgmr.msra.gmra.mrb[12].mxu1 %vm624_vm3, %v2226_v38 }
 0x392   : > { %1553 = vmatprep.mubr.msk.bf16.mxu1 %vm1912_vm1, %v1911_v8 }
 0x44c   : > { %v666_v44 = vpop.f32.mrb[0].mxu1 }
 0x44d   : > { %v667_v45 = vadd.f32 %v666_v44, %v494_v43  ;;  %v1525_v46 = vpop.f32.mrb[1].mxu1 }
 0x44e   : > { %v669_v47 = vpop.f32.mrb[2].mxu1 }
 0x44f   : > { %v1526_v48 = vpop.f32.mrb[3].mxu1  ;;  %v810_v49 = vsel %vm624_vm3, %v667_v45, -inf }
 0x450   : > { %811 = vmax.xlane.f32.xlu0 %v810_v49 }
 0x454   : > { %v712_v50 = vpop.f32.mrb[4].mxu1 }
 0x455   : > { %v713_v51 = vadd.f32 %v712_v50, %v494_v43  ;;  %v1531_v52 = vpop.f32.mrb[5].mxu1 }
 0x456   : > { %v715_v53 = vpop.f32.mrb[6].mxu1 }
 0x457   : > { %v1532_v54 = vpop.f32.mrb[7].mxu1  ;;  %v813_v55 = vsel %vm624_vm3, %v713_v51, -inf }
 0x458   : > { %814 = vmax.xlane.f32.xlu1 %v813_v55  ;;  %v1691_v54 = vld [vmem:[%s2365_s5] sm:$0xff]  }
 0x45c   : > { %v758_v56 = vpop.f32.mrb[8].mxu1 }
 0x45d   : > { %v759_v57 = vadd.f32 %v758_v56, %v494_v43  ;;  %v1537_v58 = vpop.f32.mrb[9].mxu1 }
 0x45e   : > { %v761_v59 = vpop.f32.mrb[10].mxu1  ;;  %v1692_v58 = vld [vmem:[%s2365_s5 + $0x8] sm:$0xff]  }
 0x45f   : > { %v1538_v60 = vpop.f32.mrb[11].mxu1  ;;  %v816_v61 = vsel %vm624_vm3, %v759_v57, -inf }
 0x460   : > { %817 = vmax.xlane.f32.xlu1 %v816_v61 }
 0x464   : > { %v804_v62 = vpop.f32.mrb[12].mxu1 }
 0x465   : > { %v805_v63 = vadd.f32 %v804_v62, %v494_v43  ;;  %v1543_v1 = vpop.f32.mrb[13].mxu1 }
 0x466   : > { %858 = vrot.lane.b32.xlu0 %v2196_v25, %s1918_s23  ;;  %v807_v2 = vpop.f32.mrb[14].mxu1 }
 0x467   : > { %v1544_v3 = vpop.f32.mrb[15].mxu1  ;;  %v819_v4 = vsel %vm624_vm3, %v805_v63, -inf }
 0x468   : > { %820 = vmax.xlane.f32.xlu1 %v819_v4 }
 0x479   : > { %906 = vrot.lane.b32.xlu1 %v2202_v28, %s1918_s23 }
 0x4dd   : > { %v812_v5 = vpop.xlane.xlu0 %811 }
 0x4de   : > { %v822_v6 = vsub.f32 %v667_v45, %v812_v5 }
 0x4e0   : > { %v826_v7 = vmul.f32 1.442695, %v822_v6 }
 0x4e1   : > { %v859_v9 = vpop.permute.xlu0 %858 }
 0x4e2   : > { %1701 = vpow2.f32 %v826_v7  ;;  %v864_v10 = vsel %vm628_vm2, %v859_v9, 0 }
 0x4e3   : > { %1546 = vmatpush3.bf16.msra.mxu0 %v864_v10 }
 0x4e4   : > { %1557 = vmatprep.subr.bf16.mxu0 %v1911_v8 }
 0x4e5   : > { %v815_v11 = vpop.xlane.xlu1 %814 }
 0x4e6   : > { %v823_v12 = vsub.f32 %v713_v51, %v815_v11 }
 0x4e8   : > { %v828_v13 = vmul.f32 1.442695, %v823_v12 }
 0x4ea   : > { %1703 = vpow2.f32 %v828_v13 }
 0x4ec   : > { %v1702_v14 = vpop.eup %1701 }
 0x4ed   : > { %v818_v15 = vpop.xlane.xlu1 %817  ;;  %v834_v16 = vsel %vm624_vm3, %v1702_v14, 0.0 }
 0x4ee   : > { %v824_v17 = vsub.f32 %v759_v57, %v818_v15  ;;  %835 = vadd.xlane.f32.xlu0 %v834_v16  ;;  %v1463_v16 = vld [vmem:[#allocation5] ss:$0 sm:$0xff] }
 0x4f0   : > { %v830_v18 = vmul.f32 1.442695, %v824_v17 }
 0x4f2   : > { %1705 = vpow2.f32 %v830_v18 }
 0x4f4   : > { %v1704_v19 = vpop.eup %1703 }
 0x4f5   : > { %v821_v20 = vpop.xlane.xlu1 %820  ;;  %v837_v21 = vsel %vm624_vm3, %v1704_v19, 0.0 }
 0x4f6   : > { %v825_v22 = vsub.f32 %v805_v63, %v821_v20  ;;  %838 = vadd.xlane.f32.xlu1 %v837_v21 }
 0x4f8   : > { %v832_v23 = vmul.f32 1.442695, %v825_v22 }
 0x4f9   : > { %v907_v24 = vpop.permute.xlu1 %906 }
 0x4fa   : > { %1707 = vpow2.f32 %v832_v23  ;;  %v912_v25 = vsel %vm628_vm2, %v907_v24, 0 }
 0x4fb   : > { %1552 = vmatpush3.bf16.msra.mxu1 %v912_v25 }
 0x4fc   : > { %v1706_v26 = vpop.eup %1705  ;;  %1563 = vmatprep.subr.bf16.mxu1 %v1911_v8 }
 0x4fd   : > { %v840_v27 = vsel %vm624_vm3, %v1706_v26, 0.0 }
 0x4fe   : > { %841 = vadd.xlane.f32.xlu0 %v840_v27 }
 0x504   : > { %v1708_v28 = vpop.eup %1707 }
 0x505   : > { %v843_v29 = vsel %vm624_vm3, %v1708_v28, 0.0 }
 0x506   : > { %844 = vadd.xlane.f32.xlu1 %v843_v29  ;;  %v1693_v29 = vld [vmem:[%s2369_s9] sm:$0xff]  }
 0x514   : > { %1002 = vrot.lane.b32.xlu0 %v2226_v38, %s1918_s23 }
 0x517   : > { %954 = vrot.lane.b32.xlu1 %v2219_v37, %s1918_s23 }
 0x57b   : > { %v836_v30 = vpop.xlane.xlu0 %835 }
 0x57c   : > { %1709 = vrcp.f32 %v836_v30  ;;  %v1695_v30 = vld [vmem:[%s2371_s11] sm:$0xff]  }
 0x583   : > { %v839_v31 = vpop.xlane.xlu1 %838 }
 0x584   : > { %1711 = vrcp.f32 %v839_v31  ;;  %v1696_v31 = vld [vmem:[%s2371_s11 + $0x8] sm:$0xff]  }
 0x586   : > { %v1710_v32 = vpop.eup %1709 }
 0x587   : > { %v850_v33 = vmul.f32 %v1710_v32, %v1702_v14 }
 0x589   : > { %v854_v34 = vpack.c.bf16 %v850_v33, %v850_v33 }
 0x58b   : > { %1548 = vmatmul.mubr.msk.bf16.vlgmr.msra.gmra.mrb[4].mxu0 %vm624_vm3, %v854_v34  ;;  %v842_v35 = vpop.xlane.xlu0 %841 }
 0x58c   : > { %1713 = vrcp.f32 %v842_v35  ;;  %1559 = vmatprep.mubr.msk.bf16.mxu0 %vm1912_vm1, %v1911_v8 }
 0x58e   : > { %v1712_v36 = vpop.eup %1711 }
 0x58f   : > { %v851_v39 = vmul.f32 %v1712_v36, %v1704_v19  ;;  %v1003_v38 = vpop.permute.xlu0 %1002  ;;  %v1467_v36 = vld [vmem:[#allocation7] ss:$0 sm:$0xff] }
 0x590   : > { %v1008_v37 = vsel %vm628_vm2, %v1003_v38, 0  ;;  %v1468_v38 = vld [vmem:[#allocation8] ss:$0 sm:$0xff] }
 0x591   : > { %v855_v40 = vpack.c.bf16 %v851_v39, %v851_v39 }
 0x593   : > { %1554 = vmatmul.mubr.msk.bf16.vlgmr.msra.gmra.mrb[16].mxu1 %vm624_vm3, %v855_v40  ;;  %v845_v41 = vpop.xlane.xlu1 %844 }
 0x594   : > { %1564 = vmatpush3.bf16.msra.mxu1 %v1008_v37  ;;  %1715 = vrcp.f32 %v845_v41  ;;  %1565 = vmatprep.mubr.msk.bf16.mxu1 %vm1912_vm1, %v1911_v8 }
 0x595   : > { %1577 = vmatprep.subr.bf16.mxu1 %v1911_v8 }
 0x596   : > { %v1714_v42 = vpop.eup %1713 }
 0x597   : > { %v852_v43 = vmul.f32 %v1714_v42, %v1706_v26  ;;  %v955_v44 = vpop.permute.xlu1 %954  ;;  %v1697_v42 = vld [vmem:[%s2371_s11 + $0x10] sm:$0xff]  }
 0x598   : > { %v960_v45 = vsel %vm628_vm2, %v955_v44, 0  ;;  %v1469_v44 = vld [vmem:[%s2370_s10] ss:$0 sm:$0xff] }
 0x599   : > { %1558 = vmatpush3.bf16.msra.mxu0 %v960_v45  ;;  %v856_v46 = vpack.c.bf16 %v852_v43, %v852_v43  ;;  %v1698_v43 = vld [vmem:[%s2371_s11 + $0x18] sm:$0xff]  }
 0x59a   : > { %1569 = vmatprep.subr.bf16.mxu0 %v1911_v8 }
 0x59c   : > { %1560 = vmatmul.mubr.msk.bf16.vlgmr.msra.gmra.mrb[8].mxu0 %vm624_vm3, %v856_v46 }
 0x59d   : > { %1573 = vmatprep.mubr.msk.bf16.mxu0 %vm1912_vm1, %v1911_v8  ;;  %1570 = vmatpush3.bf16.msra.mxu0 %v1691_v54 }
 0x59e   : > { %v1716_v47 = vpop.eup %1715  ;;  %1571 = vmatprep.subr.bf16.mxu0 %v1911_v8 }
 0x59f   : > { %v853_v48 = vmul.f32 %v1716_v47, %v1708_v28 }
 0x5a1   : > { %v857_v49 = vpack.c.bf16 %v853_v48, %v853_v48  ;;  %1572 = vmatpush3.bf16.msra.mxu0 %v1692_v58 }
 0x5a2   : > { %1585 = vmatprep.subr.bf16.mxu0 %v1911_v8 }
 0x5a3   : > { %1566 = vmatmul.mubr.msk.bf16.vlgmr.msra.gmra.mrb[20].mxu1 %vm624_vm3, %v857_v49 }
 0x5a4   : > { %1581 = vmatprep.mubr.msk.bf16.mxu1 %vm1912_vm1, %v1911_v8  ;;  %1578 = vmatpush3.bf16.msra.mxu1 %v1693_v29 }
 0x5a5   : > { %1579 = vmatprep.subr.bf16.mxu1 %v1911_v8 }
 0x65e   : > { %v900_v50 = vpop.f32.mrb[4].mxu0 }
 0x65f   : > { %v1549_v51 = vpop.f32.mrb[5].mxu0  ;;  %v1050_v10 = vpack.c.bf16 %v900_v50, %v900_v50 }
 0x660   : > { %v903_v52 = vpop.f32.mrb[6].mxu0 }
 0x661   : > { %v1550_v53 = vpop.f32.mrb[7].mxu0 }
 0x666   : > { %v948_v55 = vpop.f32.mrb[16].mxu1 }
 0x667   : > { %v1051_v56 = vpack.c.bf16 %v948_v55, %v948_v55  ;;  %v1555_v57 = vpop.f32.mrb[17].mxu1 }
 0x668   : > { %v951_v59 = vpop.f32.mrb[18].mxu1 }
 0x669   : > { %1055 = vrot.lane.b32.xlu1 %v1051_v56, %s1919_s14  ;;  %v1556_v60 = vpop.f32.mrb[19].mxu1  ;;  %s1922_s14 = smov [#allocation10]  }
 0x66f   : > { %v996_v61 = vpop.f32.mrb[8].mxu0 }
 0x670   : > { %v1052_v62 = vpack.c.bf16 %v996_v61, %v996_v61  ;;  %v1561_v63 = vpop.f32.mrb[9].mxu0 }
 0x671   : > { %v999_v1 = vpop.f32.mrb[10].mxu0 }
 0x672   : > { %1058 = vrot.lane.b32.xlu0 %v1052_v62, %s1920_s22  ;;  %v1562_v2 = vpop.f32.mrb[11].mxu0  ;;  %s1835_s22 = sshll.u32 %s1922_s14, 4  ;;  %s1836_s22 = int_to_ptr.vmem [resolvable:$false] %s1835_s22 }
 0x676   : > { %v1044_v3 = vpop.f32.mrb[20].mxu1 }
 0x677   : > { %v1053_v4 = vpack.c.bf16 %v1044_v3, %v1044_v3  ;;  %v1567_v5 = vpop.f32.mrb[21].mxu1 }
 0x678   : > { %v1047_v6 = vpop.f32.mrb[22].mxu1 }
 0x679   : > { %1061 = vrot.lane.b32.xlu1 %v1053_v4, %s1921_s24  ;;  %v1568_v7 = vpop.f32.mrb[23].mxu1  ;;  %s480_s24 = sand.u32 1, %s1897_s26  }
 0x67a   : > { %s1447_s13 = sshll.u32 %s480_s24, 3  ;;  %s1322_s29 = scalar_lea.sflag [#allocation4], %s480_s24 }
 0x67b   : > { %s482_s19 = scalar_lea.vmem [#allocation10], %s1447_s13  ;;  %s1837_s13 = scalar_lea.vmem %s1836_s22, 256 }
 0x67c   : > { %s1335_s20 = sshll.u32 %s482_s19, 4  ;;  %s2319_s20 = int_to_ptr.vmem [resolvable:$true] %s1335_s20 }
 0x67d   : > { %s1831_s27 = scalar_lea.vmem %s2319_s20, 128  ;;  %p1838_p8 = scmp.lt.s32.totalorder %s2319_s20, %s1836_s22 }
 0x67e   : > { %p1832_p2 = scmp.ne.s32.totalorder %s2319_s20, %s1831_s27  ;;  %p1839_p11 = scmp.lt.s32.totalorder %s1837_s13, %s1831_s27 }
 0x680   : > { %p1833_p4 = pnand %p1832_p2, %p2405_p3  ;;  %p1840_p13 = por %p1839_p11, %p1838_p8 }
 0x682   : > { %p1834_p7 = pneg %p1833_p4 }
 0x684   : > { %p1841_p1 = pnand %p1840_p13, %p1834_p7 }
 0x6db   : > { %v1056_v9 = vpop.permute.xlu1 %1055 }
 0x6dc   : > { %v1065_v12 = vsel %vm624_vm3, %v1050_v10, %v1056_v9 }
 0x6e4   : > { %v1059_v11 = vpop.permute.xlu0 %1058 }
 0x6e5   : > { %v1068_v13 = vsel %vm1066_vm5, %v1065_v12, %v1059_v11 }
 0x6eb   : > { %v1062_v14 = vpop.permute.xlu1 %1061 }
 0x6ec   : > { %v1071_v15 = vsel %vm1069_vm6, %v1068_v13, %v1062_v14 }
 0x6ed   : > { %1574 = vmatmul.mubr.msk.bf16.vlgmr.msra.gmra.mrb[12].mxu0 %vm497_vm0, %v1071_v15 }
 0x6ee   : > { %1593 = vmatprep.mubr.msk.bf16.mxu0 %vm1912_vm1, %v1911_v8  ;;  %1586 = vmatpush3.bf16.msra.mxu0 %v1695_v30 }
 0x6ef   : > { %1587 = vmatprep.subr.bf16.mxu0 %v1911_v8 }
 0x6f2   : > { %1588 = vmatpush3.bf16.msra.mxu0 %v1696_v31 }
 0x6f3   : > { %1589 = vmatprep.subr.bf16.mxu0 %v1911_v8 }
 0x6f6   : > { %1590 = vmatpush3.bf16.msra.mxu0 %v1697_v42 }
 0x6f7   : > { %1591 = vmatprep.subr.bf16.mxu0 %v1911_v8  ;;  %v1473_v8 = vld [vmem:[%s2372_s12] ss:$0 sm:$0xff] }
 0x6fa   : > { %1592 = vmatpush3.bf16.msra.mxu0 %v1698_v43 }
 0x7c0   : > { %v1131_v17 = vpop.f32.mrb[12].mxu0 }
 0x7c1   : > { %v1132_v18 = vadd.f32 %v1463_v16, %v1131_v17  ;;  %v1575_v19 = vpop.f32.mrb[13].mxu0 }
 0x7c2   : > { %v1134_v20 = vpop.f32.mrb[14].mxu0 }
 0x7c3   : > { %v1137_v21 = vadd.f32 %v1132_v18, %v2167_v0  ;;  %v1576_v22 = vpop.f32.mrb[15].mxu0  ;;  %v1694_v0 = vld [vmem:[%s2369_s9 + $0x8] sm:$0xff]  }
 0x7c4   : > { %1580 = vmatpush3.bf16.msra.mxu1 %v1694_v0 }
 0x7c5   : > { %v1140_v23 = vsel %vm497_vm0, %v1137_v21, 0.0 }
 0x7c6   : > { %1141 = vadd.xlane.f32.xlu0 %v1140_v23 }
 0x853   : > { %v1142_v24 = vpop.xlane.xlu0 %1141 }
 0x854   : > { %v1143_v25 = vmul.f32 0.03125, %v1142_v24 }
 0x856   : > { %v1144_v26 = vsub.f32 %v1137_v21, %v1143_v25 }
 0x858   : > { %v1145_v27 = vmul.f32 %v1144_v26, %v1144_v26 }
 0x85a   : > { %v1146_v28 = vsel %vm497_vm0, %v1145_v27, 0.0 }
 0x85b   : > { %1147 = vadd.xlane.f32.xlu1 %v1146_v28 }
 0x8e8   : > { %v1148_v32 = vpop.xlane.xlu1 %1147 }
 0x8e9   : > { %v1149_v33 = vmul.f32 0.03125, %v1148_v32 }
 0x8eb   : > { %v1150_v34 = vadd.f32 1e-05, %v1149_v33 }
 0x8ed   : > { %1717 = vrsqrt.f32 %v1150_v34 }
 0x8f7   : > { %v1718_v35 = vpop.eup %1717 }
 0x8f8   : > { %v1152_v39 = vmul.f32 %v1718_v35, %v1144_v26 }
 0x8fa   : > { %v1159_v40 = vmul.f32 %v1467_v36, %v1152_v39 }
 0x8fc   : > { %v1166_v37 = vadd.f32 %v1468_v38, %v1159_v40 }
 0x8fe   : > { %v1167_v41 = vpack.c.bf16 %v1166_v37, %v1166_v37 }
 0x900   : > { %1582 = vmatmul.mubr.msk.bf16.vlgmr.msra.gmra.mrb[24].mxu1 %vm497_vm0, %v1167_v41 }
 0x9d3   : > { %v1228_v45 = vpop.f32.mrb[24].mxu1 }
 0x9d4   : > { %v1229_v46 = vadd.f32 %v1469_v44, %v1228_v45  ;;  %v1583_v47 = vpop.f32.mrb[25].mxu1 }
 0x9d5   : > { %v1231_v48 = vpop.f32.mrb[26].mxu1 }
 0x9d6   : > { %v1234_v49 = vmax.f32 %v1229_v46, 0.0  ;;  %v1584_v50 = vpop.f32.mrb[27].mxu1 }
 0x9d8   : > { %v1235_v51 = vpack.c.bf16 %v1234_v49, %v1234_v49 }
 0x9da   : > { %1594 = vmatmul.mubr.msk.bf16.vlgmr.msra.gmra.mrb[16].mxu0 %vm1275_vm7, %v1235_v51 }
 0xaad   : > { %v1313_v52 = vpop.f32.mrb[16].mxu0 }
 0xaae   : > { %v1314_v53 = vadd.f32 %v1473_v8, %v1313_v52  ;;  %v1595_v54 = vpop.f32.mrb[17].mxu0 }
 0xaaf   : > { %v1316_v55 = vpop.f32.mrb[18].mxu0 }
 0xab0   : > { %v1319_v56 = vadd.f32 %v1314_v53, %v1137_v21  ;;  %v1596_v57 = vpop.f32.mrb[19].mxu0 }
 0xab2   : > { %1320 = vst.msk [vmem:[%s482_s19] sm:$0xff] %vm497_vm0, %v1319_v56 }
 0xab3   : > { %1844 = shalt.err (!%p1841_p1)
}
 0xab4   : > { %s1845_s24 = scalar_lea.hbm %s2317_s15, 128  ;;  %s1849_s17 = scalar_lea.hbm %s2404_s21, 256 }
 0xab5   : > { %p1846_p0 = scmp.ne.s32.totalorder %s2317_s15, %s1845_s24  ;;  %p1850_p9 = scmp.lt.u32.totalorder %s2317_s15, %s2404_s21 }
 0xab6   : > { %p1851_p12 = scmp.lt.u32.totalorder %s1849_s17, %s1845_s24  ;;  %p1853_p2 = scmp.lt.u32.totalorder %s1845_s24, %s2317_s15 }
 0xab7   : > { %p1847_p6 = pnand %p1846_p0, %p2405_p3 }
 0xab8   : > { %p1852_p10 = por %p1851_p12, %p1850_p9 }
 0xab9   : > { %p1848_p5 = pneg %p1847_p6 }
 0xaba   : > { %p1854_p4 = por %p1853_p2, %p1852_p10 }
 0xabc   : > { %p1855_p7 = pnand %p1854_p4, %p1848_p5 }
 0xabe   : > { %1858 = shalt.err (!%p1855_p7)
}
 0xabf   : > { %1613 = dma.vmem_to_hbm [thread:$0]  (%p2405_p3), %s2319_s20, 128, %s2317_s15, %s1322_s29  }
 0xac0 PF: > { %s2406_s23 = sld [smem:[#allocation17_spill]]  ;;  %s2407_s25 = sld [smem:[#allocation15_spill]] }
 0xac1   : > { %s2408_s27 = sld [smem:[#allocation20_spill]] }
 0xac6   : > { %p1640_p8 = scmp.ge.s32.totalorder %s2406_s23, 2  ;;  %s1347_s14 = sand.u32 1, %s2407_s25  }
 0xac7   : > { %p2409_p11 = scmp.ne.s32.totalorder %s2408_s27, 0  ;;  %s1348_s22 = scalar_lea.sflag [#allocation4], %s1347_s14 }
 0xac9   : > { %p1629_p13 = pnand %p1640_p8, %p2409_p11 }
 0xacb   : > { %1888 = dma.done.wait (!%p1629_p13), %s1348_s22, 128  }
 0xacc   : > { %1890 = vsyncadd (!%p1629_p13), %s1348_s22, 4294967168  ;;  %s2410_s28 = sld [smem:[#allocation18_spill]]  ;;  %s2411_s13 = sld [smem:[#allocation16_spill]] }
 0xacd   : > { %s2412_s27 = sld [smem:[#allocation19_spill]]  ;;  %s2413_s25 = smov %s1897_s26 }
 0xad2   : > { %p26_p1 = scmp.ge.s32.totalorder %s2410_s28, 4   ;;  %s2414_s26 = smov %s2411_s13 }
 0xad4   :  { %28 = sbr.rel (!%p26_p1) target bundleno = 8 (0x8), region = 124 }
 0xadb   :  { %1353 = vsyncpa [#allocation3], 1 }
 0xadc   :  { %1355 = vsyncpa [#allocation3 + $0x1], 1 }
 0xadd   :  { %1356 = vsyncpa [#allocation6], 1 }
 0xade   :  { %1357 = vsyncpa [#allocation9], 1 }
 0xadf   :  { %1358 = vsyncpa [#allocation4], 1 }
 0xae0   :  { %1360 = vsyncpa [#allocation4 + $0x1], 1 }

</bundles_post_ra>
